<compile_context>
chip_gen: v5e
topology: v5e:2x2
jax: 0.10.0
libtpu: 0.0.40
codegen_flags: <defaults>
</compile_context>

<pallas_src>
import functools

import jax
import jax.numpy as jnp
import numpy as np
from jax import lax
from jax.experimental import pallas as pl
from jax.experimental.pallas import tpu as pltpu


def rnn_kernel(x_ref, h0_ref, c0_ref,
               wih_ref, whh_ref, bih_ref,
               w1_ref, b1_ref, w2w_ref,
               wl_ref, bl_ref,
               out_ref,
               *, valid_b):
    T, B, D2 = x_ref.shape        # fused input width 2*D  ([x_t | x_{T-1-t}])
    H2 = h0_ref.shape[1]          # 2 * hidden   (fused fwd|bwd state width)
    H = H2 // 2
    G = 4 * H2                    # 8 * hidden   (fused, pair-interleaved gates)
    A = w1_ref.shape[1]           # 2 * H2       (two attention branches)
    f32 = jnp.float32
    bf16 = jnp.bfloat16

    # ---- hoisted input projection for BOTH directions (bias folded in);
    #      thanks to the fused [x_t | x_{T-1-t}] input + block-diagonal weight,
    #      gx row-block s is already gate-aligned for fwd AND bwd directions ----
    x_flat = x_ref[...].astype(bf16).reshape(T * B, D2)
    gx = jnp.dot(x_flat, wih_ref[...], preferred_element_type=f32) + bih_ref[...]

    # ---- fused fwd/bwd recurrence, fully unrolled; everything stays in vregs ----
    whh = whh_ref[...]            # (2H, 8H) bf16 — loaded ONCE, loop-invariant
    h = h0_ref[...]               # (B, 2H) = [h_fwd | h_bwd]
    c = c0_ref[...]
    hs = []
    # TODO(synk): explicit MXU weight staging (pltpu.matmul_push_rhs/acc/pop)
    # could keep whh in the MXU weight registers across all T steps; kept on
    # the portable jnp.dot path here.
    for s in range(T):
        gates = gx[s * B:(s + 1) * B, :] + jnp.dot(
            h.astype(bf16), whh, preferred_element_type=f32)          # (B, 8H)
        sf = jax.nn.sigmoid(gates[:, :2 * H2])      # [i|f] — one 128-lane slab
        i = sf[:, :H2]
        f = sf[:, H2:]
        g = jnp.tanh(gates[:, 2 * H2:3 * H2])
        o = jax.nn.sigmoid(gates[:, 3 * H2:])
        c = f * c + i * g
        h = o * jnp.tanh(c)
        hs.append(h)              # (B, 2H): fwd hidden @ t=s, bwd hidden @ t=T-1-s

    # ---- re-align the bwd halves in time and assemble the sequence value ----
    fwd_lane = lax.broadcasted_iota(jnp.int32, (B, H2), 1) < H
    seq_rows = [jnp.where(fwd_lane, hs[t], hs[T - 1 - t]) for t in range(T)]
    flat = jnp.concatenate(seq_rows, axis=0)         # (T*B, 2H)
    seq = flat.reshape(T, B, H2)                     # (T, B, 2H)

    # ---- two-fold attention pooling (sigmoid(alpha) pre-folded into w2w) ----
    squish = jnp.tanh(jnp.dot(flat.astype(bf16), w1_ref[...],
                              preferred_element_type=f32) + b1_ref[...])   # (T*B, 4H)
    scores = jnp.sum(squish.reshape(T, B, A) * w2w_ref[...].reshape(1, 1, A),
                     axis=-1)                        # (T, B)

    # softmax over the BATCH axis (torch: softmax(emb_attn.squeeze(2), dim=0)),
    # masking out the zero-padded batch columns
    if valid_b < B:
        col = lax.broadcasted_iota(jnp.int32, (T, B), 1)
        scores = jnp.where(col < valid_b, scores, f32(-1e30))
    m = jnp.max(scores, axis=1, keepdims=True)
    e = jnp.exp(scores - m)
    attn = e * pl.reciprocal(jnp.sum(e, axis=1, keepdims=True), approx=True)

    # bmm(out.transpose(1,2), w.unsqueeze(2)).squeeze(2)  -> (B, 2H)
    vec = jnp.sum(seq * attn[:, :, None], axis=0)
    out_ref[...] = (jnp.dot(vec.astype(bf16), wl_ref[...],
                            preferred_element_type=f32) + bl_ref[...])


def _pack_gate_pairs(wf, wb, hidden):
    """Interleave per-gate column blocks: [i_f i_b | f_f f_b | g_f g_b | o_f o_b]."""
    parts = []
    for g in range(4):
        parts.append(wf[:, g * hidden:(g + 1) * hidden])
        parts.append(wb[:, g * hidden:(g + 1) * hidden])
    return jnp.concatenate(parts, axis=1)


@jax.jit
def rnn_forward_pallas(x, h0, c0, p):
    B, T, D = x.shape
    H = h0.shape[2]
    H2 = 2 * H
    C = p["wl"].shape[1]
    Bp = ((B + 7) // 8) * 8          # sublane-pad the batch
    Cp = ((C + 127) // 128) * 128    # lane-pad the classifier output
    bf16 = jnp.bfloat16

    # ---- layout plumbing (wrapper): time-major, padded, fused-direction ----
    x_tm = jnp.transpose(jnp.pad(x, ((0, Bp - B), (0, 0), (0, 0))), (1, 0, 2))
    # fused directional input [x_t | x_{T-1-t}] pre-aligns the bwd gate inputs
    x_fused = jnp.concatenate([x_tm, x_tm[::-1]], axis=-1)            # (T, Bp, 2D)

    h0_c = jnp.concatenate([jnp.pad(h0[0], ((0, Bp - B), (0, 0))),
                            jnp.pad(h0[1], ((0, Bp - B), (0, 0)))], axis=-1)
    c0_c = jnp.concatenate([jnp.pad(c0[0], ((0, Bp - B), (0, 0))),
                            jnp.pad(c0[1], ((0, Bp - B), (0, 0)))], axis=-1)

    # ---- one-time weight repacking into fused, pair-interleaved gate layout ----
    zD = jnp.zeros((D, 4 * H), jnp.float32)
    zH = jnp.zeros((H, 4 * H), jnp.float32)
    # block-diagonal (2D, 8H): fwd gate lanes read x_t, bwd gate lanes x_{T-1-t}
    wih_c = _pack_gate_pairs(jnp.concatenate([p["wih_f"], zD], axis=0),
                             jnp.concatenate([zD, p["wih_b"]], axis=0),
                             H).astype(bf16)                            # (2D, 8H)
    bih_c = _pack_gate_pairs(p["b_f"], p["b_b"], H)                     # (1, 8H)
    whh_c = _pack_gate_pairs(jnp.concatenate([p["whh_f"], zH], axis=0),
                             jnp.concatenate([zH, p["whh_b"]], axis=0),
                             H).astype(bf16)                            # (2H, 8H)
    w1_c = jnp.concatenate([p["w1"], p["w1a"]], axis=1).astype(bf16)    # (2H, 4H)
    b1_c = jnp.concatenate([p["b1"], p["b1a"]], axis=1)                 # (1, 4H)
    # fold sigmoid(alpha) into a single precombined attention weight
    a_sig = jax.nn.sigmoid(p["alpha"][0])
    w2w = jnp.concatenate([a_sig * p["w2"],
                           (1.0 - a_sig) * p["w2a"]], axis=1)           # (1, 4H)
    wl_p = jnp.pad(p["wl"], ((0, 0), (0, Cp - C))).astype(bf16)         # (2H, Cp)
    bl_p = jnp.pad(p["bl"], ((0, 0), (0, Cp - C)))                      # (1, Cp)

    vmem = pl.BlockSpec(memory_space=pltpu.MemorySpace.VMEM)

    out = pl.pallas_call(
        functools.partial(rnn_kernel, valid_b=B),
        out_shape=jax.ShapeDtypeStruct((Bp, Cp), jnp.float32),
        in_specs=[vmem] * 11,
        out_specs=vmem,
    )(x_fused, h0_c, c0_c, wih_c, whh_c, bih_c,
      w1_c, b1_c, w2w, wl_p, bl_p)
    return out[:B, :C]


def rnn_forward_ref(x, h0, c0, p):
    """Pure-JAX f32 reference of the same forward pass."""
    B, T, _ = x.shape
    H = h0.shape[2]
    H2 = 2 * H
    x_tm = jnp.transpose(x, (1, 0, 2))

    def make_step(wih, whh, b):
        def step(carry, xt):
            h, c = carry
            g = xt @ wih + h @ whh + b
            i = jax.nn.sigmoid(g[:, :H])
            f = jax.nn.sigmoid(g[:, H:2 * H])
            gg = jnp.tanh(g[:, 2 * H:3 * H])
            o = jax.nn.sigmoid(g[:, 3 * H:])
            c = f * c + i * gg
            h = o * jnp.tanh(c)
            return (h, c), h
        return step

    _, fwd = lax.scan(make_step(p["wih_f"], p["whh_f"], p["b_f"]),
                      (h0[0], c0[0]), x_tm)
    _, bwd_r = lax.scan(make_step(p["wih_b"], p["whh_b"], p["b_b"]),
                        (h0[1], c0[1]), x_tm[::-1])
    bwd = bwd_r[::-1]
    out = jnp.concatenate([fwd, bwd], axis=-1)           # (T, B, 2H)
    flat = out.reshape(T * B, H2)
    s1 = (jnp.tanh(flat @ p["w1"] + p["b1"]) * p["w2"]).sum(-1).reshape(T, B)
    s2 = (jnp.tanh(flat @ p["w1a"] + p["b1a"]) * p["w2a"]).sum(-1).reshape(T, B)
    alpha = jax.nn.sigmoid(p["alpha"][0])
    attn = alpha * s1 + (1.0 - alpha) * s2
    attn_norm = jax.nn.softmax(attn, axis=1)             # softmax over batch axis
    vec = jnp.sum(out * attn_norm[:, :, None], axis=0)   # (B, 2H)
    return vec @ p["wl"] + p["bl"]


def init_params(key, D, H, C):
    """Deterministic synthetic parameters (PyTorch-style uniform init)."""
    H2 = 2 * H
    ks = jax.random.split(key, 16)

    def u(k, shape, bound):
        return jax.random.uniform(k, shape, jnp.float32, -bound, bound)

    kb = 1.0 / np.sqrt(H)
    ka = 1.0 / np.sqrt(H2)
    return dict(
        # LSTM weights pre-transposed to (in, 4H); bias = b_ih + b_hh
        wih_f=u(ks[0], (D, 4 * H), kb),
        whh_f=u(ks[1], (H, 4 * H), kb),
        b_f=u(ks[2], (1, 4 * H), kb) + u(ks[3], (1, 4 * H), kb),
        wih_b=u(ks[4], (D, 4 * H), kb),
        whh_b=u(ks[5], (H, 4 * H), kb),
        b_b=u(ks[6], (1, 4 * H), kb) + u(ks[7], (1, 4 * H), kb),
        # attention
        w1=u(ks[8], (H2, H2), ka),
        b1=u(ks[9], (1, H2), ka),
        w2=u(ks[10], (1, H2), ka),
        w1a=u(ks[11], (H2, H2), ka),
        b1a=u(ks[12], (1, H2), ka),
        w2a=u(ks[13], (1, H2), ka),
        alpha=jnp.zeros((1,), jnp.float32),   # nn.Parameter(torch.zeros(1))
        # classifier
        wl=u(ks[14], (H2, C), ka),
        bl=u(ks[15], (1, C), ka),
    )


if __name__ == "__main__":
    # batch=2, seq=8, input=16, hidden=32, n_classes=4, bidirectional LSTM
    B, T, D, H, C = 2, 8, 16, 32, 4
    key = jax.random.PRNGKey(0)
    kx, kp = jax.random.split(key)

    x = jax.random.normal(kx, (B, T, D), jnp.float32)
    # init_hidden(): zeros of shape (2, B, H) for h0 and c0
    h0 = jnp.zeros((2, B, H), jnp.float32)
    c0 = jnp.zeros((2, B, H), jnp.float32)
    params = init_params(kp, D, H, C)

    out = jax.block_until_ready(rnn_forward_pallas(x, h0, c0, params))
    ref = jax.block_until_ready(rnn_forward_ref(x, h0, c0, params))

    assert out.shape == (B, C), out.shape
    np.testing.assert_allclose(np.asarray(out), np.asarray(ref),
                               rtol=5e-2, atol=5e-2)
    print("KERNEL_OK")
</pallas_src>

<mosaic_0001>
module attributes {stable_mosaic.version = 11 : i64} {
  func.func @rnn_kernel(%arg0: memref<8x8x32xf32, #tpu.memory_space<vmem>>, %arg1: memref<8x64xf32, #tpu.memory_space<vmem>>, %arg2: memref<8x64xf32, #tpu.memory_space<vmem>>, %arg3: memref<32x256xbf16, #tpu.memory_space<vmem>>, %arg4: memref<64x256xbf16, #tpu.memory_space<vmem>>, %arg5: memref<1x256xf32, #tpu.memory_space<vmem>>, %arg6: memref<64x128xbf16, #tpu.memory_space<vmem>>, %arg7: memref<1x128xf32, #tpu.memory_space<vmem>>, %arg8: memref<1x128xf32, #tpu.memory_space<vmem>>, %arg9: memref<64x128xbf16, #tpu.memory_space<vmem>>, %arg10: memref<1x128xf32, #tpu.memory_space<vmem>>, %arg11: memref<8x128xf32, #tpu.memory_space<vmem>>) attributes {dimension_semantics = [], scalar_prefetch = 0 : i64, scratch_operands = 0 : i64, tpu.core_type = #tpu.core_type<tc>} {
    %c0 = arith.constant 0 : index
    %c0_0 = arith.constant 0 : index
    %c0_1 = arith.constant 0 : index
    %0 = vector.load %arg0[%c0, %c0_0, %c0_1] : memref<8x8x32xf32, #tpu.memory_space<vmem>>, vector<8x8x32xf32>
    %1 = arith.truncf %0 : vector<8x8x32xf32> to vector<8x8x32xbf16>
    %2 = vector.shape_cast %1 : vector<8x8x32xbf16> to vector<64x32xbf16>
    %c0_2 = arith.constant 0 : index
    %c0_3 = arith.constant 0 : index
    %3 = vector.load %arg3[%c0_2, %c0_3] : memref<32x256xbf16, #tpu.memory_space<vmem>>, vector<32x256xbf16>
    %cst = arith.constant dense<0.000000e+00> : vector<64x256xf32>
    %4 = tpu.matmul %2, %3, %cst {dimension_numbers = #tpu.dot_dimension_numbers<[1], [0], [0], [1], [0, 0, 1, 1], [], []>} : vector<64x32xbf16>, vector<32x256xbf16>, vector<64x256xf32> -> vector<64x256xf32>
    %c0_4 = arith.constant 0 : index
    %c0_5 = arith.constant 0 : index
    %5 = vector.load %arg5[%c0_4, %c0_5] : memref<1x256xf32, #tpu.memory_space<vmem>>, vector<1x256xf32>
    %6 = vector.broadcast %5 : vector<1x256xf32> to vector<64x256xf32>
    %7 = arith.addf %4, %6 : vector<64x256xf32>
    %c0_6 = arith.constant 0 : index
    %c0_7 = arith.constant 0 : index
    %8 = vector.load %arg4[%c0_6, %c0_7] : memref<64x256xbf16, #tpu.memory_space<vmem>>, vector<64x256xbf16>
    %c0_8 = arith.constant 0 : index
    %c0_9 = arith.constant 0 : index
    %9 = vector.load %arg1[%c0_8, %c0_9] : memref<8x64xf32, #tpu.memory_space<vmem>>, vector<8x64xf32>
    %c0_10 = arith.constant 0 : index
    %c0_11 = arith.constant 0 : index
    %10 = vector.load %arg2[%c0_10, %c0_11] : memref<8x64xf32, #tpu.memory_space<vmem>>, vector<8x64xf32>
    %11 = vector.extract_strided_slice %7 {offsets = [0, 0], sizes = [8, 256], strides = [1, 1]} : vector<64x256xf32> to vector<8x256xf32>
    %12 = arith.truncf %9 : vector<8x64xf32> to vector<8x64xbf16>
    %cst_12 = arith.constant dense<0.000000e+00> : vector<8x256xf32>
    %13 = tpu.matmul %12, %8, %cst_12 {dimension_numbers = #tpu.dot_dimension_numbers<[1], [0], [0], [1], [0, 0, 1, 1], [], []>} : vector<8x64xbf16>, vector<64x256xbf16>, vector<8x256xf32> -> vector<8x256xf32>
    %14 = arith.addf %11, %13 : vector<8x256xf32>
    %15 = vector.extract_strided_slice %14 {offsets = [0, 0], sizes = [8, 128], strides = [1, 1]} : vector<8x256xf32> to vector<8x128xf32>
    %16 = arith.negf %15 : vector<8x128xf32>
    %17 = math.exp %16 : vector<8x128xf32>
    %cst_13 = arith.constant 1.000000e+00 : f32
    %18 = vector.broadcast %cst_13 : f32 to vector<8x128xf32>
    %19 = arith.addf %18, %17 : vector<8x128xf32>
    %20 = arith.divf %18, %19 : vector<8x128xf32>
    %21 = vector.extract_strided_slice %20 {offsets = [0, 0], sizes = [8, 64], strides = [1, 1]} : vector<8x128xf32> to vector<8x64xf32>
    %22 = vector.extract_strided_slice %20 {offsets = [0, 64], sizes = [8, 64], strides = [1, 1]} : vector<8x128xf32> to vector<8x64xf32>
    %23 = vector.extract_strided_slice %14 {offsets = [0, 128], sizes = [8, 64], strides = [1, 1]} : vector<8x256xf32> to vector<8x64xf32>
    %24 = math.tanh %23 : vector<8x64xf32>
    %25 = vector.extract_strided_slice %14 {offsets = [0, 192], sizes = [8, 64], strides = [1, 1]} : vector<8x256xf32> to vector<8x64xf32>
    %26 = arith.negf %25 : vector<8x64xf32>
    %27 = math.exp %26 : vector<8x64xf32>
    %cst_14 = arith.constant 1.000000e+00 : f32
    %28 = vector.broadcast %cst_14 : f32 to vector<8x64xf32>
    %29 = arith.addf %28, %27 : vector<8x64xf32>
    %30 = arith.divf %28, %29 : vector<8x64xf32>
    %31 = arith.mulf %22, %10 : vector<8x64xf32>
    %32 = arith.mulf %21, %24 : vector<8x64xf32>
    %33 = arith.addf %31, %32 : vector<8x64xf32>
    %34 = math.tanh %33 : vector<8x64xf32>
    %35 = arith.mulf %30, %34 : vector<8x64xf32>
    %36 = vector.extract_strided_slice %7 {offsets = [8, 0], sizes = [8, 256], strides = [1, 1]} : vector<64x256xf32> to vector<8x256xf32>
    %37 = arith.truncf %35 : vector<8x64xf32> to vector<8x64xbf16>
    %cst_15 = arith.constant dense<0.000000e+00> : vector<8x256xf32>
    %38 = tpu.matmul %37, %8, %cst_15 {dimension_numbers = #tpu.dot_dimension_numbers<[1], [0], [0], [1], [0, 0, 1, 1], [], []>} : vector<8x64xbf16>, vector<64x256xbf16>, vector<8x256xf32> -> vector<8x256xf32>
    %39 = arith.addf %36, %38 : vector<8x256xf32>
    %40 = vector.extract_strided_slice %39 {offsets = [0, 0], sizes = [8, 128], strides = [1, 1]} : vector<8x256xf32> to vector<8x128xf32>
    %41 = arith.negf %40 : vector<8x128xf32>
    %42 = math.exp %41 : vector<8x128xf32>
    %cst_16 = arith.constant 1.000000e+00 : f32
    %43 = vector.broadcast %cst_16 : f32 to vector<8x128xf32>
    %44 = arith.addf %43, %42 : vector<8x128xf32>
    %45 = arith.divf %43, %44 : vector<8x128xf32>
    %46 = vector.extract_strided_slice %45 {offsets = [0, 0], sizes = [8, 64], strides = [1, 1]} : vector<8x128xf32> to vector<8x64xf32>
    %47 = vector.extract_strided_slice %45 {offsets = [0, 64], sizes = [8, 64], strides = [1, 1]} : vector<8x128xf32> to vector<8x64xf32>
    %48 = vector.extract_strided_slice %39 {offsets = [0, 128], sizes = [8, 64], strides = [1, 1]} : vector<8x256xf32> to vector<8x64xf32>
    %49 = math.tanh %48 : vector<8x64xf32>
    %50 = vector.extract_strided_slice %39 {offsets = [0, 192], sizes = [8, 64], strides = [1, 1]} : vector<8x256xf32> to vector<8x64xf32>
    %51 = arith.negf %50 : vector<8x64xf32>
    %52 = math.exp %51 : vector<8x64xf32>
    %cst_17 = arith.constant 1.000000e+00 : f32
    %53 = vector.broadcast %cst_17 : f32 to vector<8x64xf32>
    %54 = arith.addf %53, %52 : vector<8x64xf32>
    %55 = arith.divf %53, %54 : vector<8x64xf32>
    %56 = arith.mulf %47, %33 : vector<8x64xf32>
    %57 = arith.mulf %46, %49 : vector<8x64xf32>
    %58 = arith.addf %56, %57 : vector<8x64xf32>
    %59 = math.tanh %58 : vector<8x64xf32>
    %60 = arith.mulf %55, %59 : vector<8x64xf32>
    %61 = vector.extract_strided_slice %7 {offsets = [16, 0], sizes = [8, 256], strides = [1, 1]} : vector<64x256xf32> to vector<8x256xf32>
    %62 = arith.truncf %60 : vector<8x64xf32> to vector<8x64xbf16>
    %cst_18 = arith.constant dense<0.000000e+00> : vector<8x256xf32>
    %63 = tpu.matmul %62, %8, %cst_18 {dimension_numbers = #tpu.dot_dimension_numbers<[1], [0], [0], [1], [0, 0, 1, 1], [], []>} : vector<8x64xbf16>, vector<64x256xbf16>, vector<8x256xf32> -> vector<8x256xf32>
    %64 = arith.addf %61, %63 : vector<8x256xf32>
    %65 = vector.extract_strided_slice %64 {offsets = [0, 0], sizes = [8, 128], strides = [1, 1]} : vector<8x256xf32> to vector<8x128xf32>
    %66 = arith.negf %65 : vector<8x128xf32>
    %67 = math.exp %66 : vector<8x128xf32>
    %cst_19 = arith.constant 1.000000e+00 : f32
    %68 = vector.broadcast %cst_19 : f32 to vector<8x128xf32>
    %69 = arith.addf %68, %67 : vector<8x128xf32>
    %70 = arith.divf %68, %69 : vector<8x128xf32>
    %71 = vector.extract_strided_slice %70 {offsets = [0, 0], sizes = [8, 64], strides = [1, 1]} : vector<8x128xf32> to vector<8x64xf32>
    %72 = vector.extract_strided_slice %70 {offsets = [0, 64], sizes = [8, 64], strides = [1, 1]} : vector<8x128xf32> to vector<8x64xf32>
    %73 = vector.extract_strided_slice %64 {offsets = [0, 128], sizes = [8, 64], strides = [1, 1]} : vector<8x256xf32> to vector<8x64xf32>
    %74 = math.tanh %73 : vector<8x64xf32>
    %75 = vector.extract_strided_slice %64 {offsets = [0, 192], sizes = [8, 64], strides = [1, 1]} : vector<8x256xf32> to vector<8x64xf32>
    %76 = arith.negf %75 : vector<8x64xf32>
    %77 = math.exp %76 : vector<8x64xf32>
    %cst_20 = arith.constant 1.000000e+00 : f32
    %78 = vector.broadcast %cst_20 : f32 to vector<8x64xf32>
    %79 = arith.addf %78, %77 : vector<8x64xf32>
    %80 = arith.divf %78, %79 : vector<8x64xf32>
    %81 = arith.mulf %72, %58 : vector<8x64xf32>
    %82 = arith.mulf %71, %74 : vector<8x64xf32>
    %83 = arith.addf %81, %82 : vector<8x64xf32>
    %84 = math.tanh %83 : vector<8x64xf32>
    %85 = arith.mulf %80, %84 : vector<8x64xf32>
    %86 = vector.extract_strided_slice %7 {offsets = [24, 0], sizes = [8, 256], strides = [1, 1]} : vector<64x256xf32> to vector<8x256xf32>
    %87 = arith.truncf %85 : vector<8x64xf32> to vector<8x64xbf16>
    %cst_21 = arith.constant dense<0.000000e+00> : vector<8x256xf32>
    %88 = tpu.matmul %87, %8, %cst_21 {dimension_numbers = #tpu.dot_dimension_numbers<[1], [0], [0], [1], [0, 0, 1, 1], [], []>} : vector<8x64xbf16>, vector<64x256xbf16>, vector<8x256xf32> -> vector<8x256xf32>
    %89 = arith.addf %86, %88 : vector<8x256xf32>
    %90 = vector.extract_strided_slice %89 {offsets = [0, 0], sizes = [8, 128], strides = [1, 1]} : vector<8x256xf32> to vector<8x128xf32>
    %91 = arith.negf %90 : vector<8x128xf32>
    %92 = math.exp %91 : vector<8x128xf32>
    %cst_22 = arith.constant 1.000000e+00 : f32
    %93 = vector.broadcast %cst_22 : f32 to vector<8x128xf32>
    %94 = arith.addf %93, %92 : vector<8x128xf32>
    %95 = arith.divf %93, %94 : vector<8x128xf32>
    %96 = vector.extract_strided_slice %95 {offsets = [0, 0], sizes = [8, 64], strides = [1, 1]} : vector<8x128xf32> to vector<8x64xf32>
    %97 = vector.extract_strided_slice %95 {offsets = [0, 64], sizes = [8, 64], strides = [1, 1]} : vector<8x128xf32> to vector<8x64xf32>
    %98 = vector.extract_strided_slice %89 {offsets = [0, 128], sizes = [8, 64], strides = [1, 1]} : vector<8x256xf32> to vector<8x64xf32>
    %99 = math.tanh %98 : vector<8x64xf32>
    %100 = vector.extract_strided_slice %89 {offsets = [0, 192], sizes = [8, 64], strides = [1, 1]} : vector<8x256xf32> to vector<8x64xf32>
    %101 = arith.negf %100 : vector<8x64xf32>
    %102 = math.exp %101 : vector<8x64xf32>
    %cst_23 = arith.constant 1.000000e+00 : f32
    %103 = vector.broadcast %cst_23 : f32 to vector<8x64xf32>
    %104 = arith.addf %103, %102 : vector<8x64xf32>
    %105 = arith.divf %103, %104 : vector<8x64xf32>
    %106 = arith.mulf %97, %83 : vector<8x64xf32>
    %107 = arith.mulf %96, %99 : vector<8x64xf32>
    %108 = arith.addf %106, %107 : vector<8x64xf32>
    %109 = math.tanh %108 : vector<8x64xf32>
    %110 = arith.mulf %105, %109 : vector<8x64xf32>
    %111 = vector.extract_strided_slice %7 {offsets = [32, 0], sizes = [8, 256], strides = [1, 1]} : vector<64x256xf32> to vector<8x256xf32>
    %112 = arith.truncf %110 : vector<8x64xf32> to vector<8x64xbf16>
    %cst_24 = arith.constant dense<0.000000e+00> : vector<8x256xf32>
    %113 = tpu.matmul %112, %8, %cst_24 {dimension_numbers = #tpu.dot_dimension_numbers<[1], [0], [0], [1], [0, 0, 1, 1], [], []>} : vector<8x64xbf16>, vector<64x256xbf16>, vector<8x256xf32> -> vector<8x256xf32>
    %114 = arith.addf %111, %113 : vector<8x256xf32>
    %115 = vector.extract_strided_slice %114 {offsets = [0, 0], sizes = [8, 128], strides = [1, 1]} : vector<8x256xf32> to vector<8x128xf32>
    %116 = arith.negf %115 : vector<8x128xf32>
    %117 = math.exp %116 : vector<8x128xf32>
    %cst_25 = arith.constant 1.000000e+00 : f32
    %118 = vector.broadcast %cst_25 : f32 to vector<8x128xf32>
    %119 = arith.addf %118, %117 : vector<8x128xf32>
    %120 = arith.divf %118, %119 : vector<8x128xf32>
    %121 = vector.extract_strided_slice %120 {offsets = [0, 0], sizes = [8, 64], strides = [1, 1]} : vector<8x128xf32> to vector<8x64xf32>
    %122 = vector.extract_strided_slice %120 {offsets = [0, 64], sizes = [8, 64], strides = [1, 1]} : vector<8x128xf32> to vector<8x64xf32>
    %123 = vector.extract_strided_slice %114 {offsets = [0, 128], sizes = [8, 64], strides = [1, 1]} : vector<8x256xf32> to vector<8x64xf32>
    %124 = math.tanh %123 : vector<8x64xf32>
    %125 = vector.extract_strided_slice %114 {offsets = [0, 192], sizes = [8, 64], strides = [1, 1]} : vector<8x256xf32> to vector<8x64xf32>
    %126 = arith.negf %125 : vector<8x64xf32>
    %127 = math.exp %126 : vector<8x64xf32>
    %cst_26 = arith.constant 1.000000e+00 : f32
    %128 = vector.broadcast %cst_26 : f32 to vector<8x64xf32>
    %129 = arith.addf %128, %127 : vector<8x64xf32>
    %130 = arith.divf %128, %129 : vector<8x64xf32>
    %131 = arith.mulf %122, %108 : vector<8x64xf32>
    %132 = arith.mulf %121, %124 : vector<8x64xf32>
    %133 = arith.addf %131, %132 : vector<8x64xf32>
    %134 = math.tanh %133 : vector<8x64xf32>
    %135 = arith.mulf %130, %134 : vector<8x64xf32>
    %136 = vector.extract_strided_slice %7 {offsets = [40, 0], sizes = [8, 256], strides = [1, 1]} : vector<64x256xf32> to vector<8x256xf32>
    %137 = arith.truncf %135 : vector<8x64xf32> to vector<8x64xbf16>
    %cst_27 = arith.constant dense<0.000000e+00> : vector<8x256xf32>
    %138 = tpu.matmul %137, %8, %cst_27 {dimension_numbers = #tpu.dot_dimension_numbers<[1], [0], [0], [1], [0, 0, 1, 1], [], []>} : vector<8x64xbf16>, vector<64x256xbf16>, vector<8x256xf32> -> vector<8x256xf32>
    %139 = arith.addf %136, %138 : vector<8x256xf32>
    %140 = vector.extract_strided_slice %139 {offsets = [0, 0], sizes = [8, 128], strides = [1, 1]} : vector<8x256xf32> to vector<8x128xf32>
    %141 = arith.negf %140 : vector<8x128xf32>
    %142 = math.exp %141 : vector<8x128xf32>
    %cst_28 = arith.constant 1.000000e+00 : f32
    %143 = vector.broadcast %cst_28 : f32 to vector<8x128xf32>
    %144 = arith.addf %143, %142 : vector<8x128xf32>
    %145 = arith.divf %143, %144 : vector<8x128xf32>
    %146 = vector.extract_strided_slice %145 {offsets = [0, 0], sizes = [8, 64], strides = [1, 1]} : vector<8x128xf32> to vector<8x64xf32>
    %147 = vector.extract_strided_slice %145 {offsets = [0, 64], sizes = [8, 64], strides = [1, 1]} : vector<8x128xf32> to vector<8x64xf32>
    %148 = vector.extract_strided_slice %139 {offsets = [0, 128], sizes = [8, 64], strides = [1, 1]} : vector<8x256xf32> to vector<8x64xf32>
    %149 = math.tanh %148 : vector<8x64xf32>
    %150 = vector.extract_strided_slice %139 {offsets = [0, 192], sizes = [8, 64], strides = [1, 1]} : vector<8x256xf32> to vector<8x64xf32>
    %151 = arith.negf %150 : vector<8x64xf32>
    %152 = math.exp %151 : vector<8x64xf32>
    %cst_29 = arith.constant 1.000000e+00 : f32
    %153 = vector.broadcast %cst_29 : f32 to vector<8x64xf32>
    %154 = arith.addf %153, %152 : vector<8x64xf32>
    %155 = arith.divf %153, %154 : vector<8x64xf32>
    %156 = arith.mulf %147, %133 : vector<8x64xf32>
    %157 = arith.mulf %146, %149 : vector<8x64xf32>
    %158 = arith.addf %156, %157 : vector<8x64xf32>
    %159 = math.tanh %158 : vector<8x64xf32>
    %160 = arith.mulf %155, %159 : vector<8x64xf32>
    %161 = vector.extract_strided_slice %7 {offsets = [48, 0], sizes = [8, 256], strides = [1, 1]} : vector<64x256xf32> to vector<8x256xf32>
    %162 = arith.truncf %160 : vector<8x64xf32> to vector<8x64xbf16>
    %cst_30 = arith.constant dense<0.000000e+00> : vector<8x256xf32>
    %163 = tpu.matmul %162, %8, %cst_30 {dimension_numbers = #tpu.dot_dimension_numbers<[1], [0], [0], [1], [0, 0, 1, 1], [], []>} : vector<8x64xbf16>, vector<64x256xbf16>, vector<8x256xf32> -> vector<8x256xf32>
    %164 = arith.addf %161, %163 : vector<8x256xf32>
    %165 = vector.extract_strided_slice %164 {offsets = [0, 0], sizes = [8, 128], strides = [1, 1]} : vector<8x256xf32> to vector<8x128xf32>
    %166 = arith.negf %165 : vector<8x128xf32>
    %167 = math.exp %166 : vector<8x128xf32>
    %cst_31 = arith.constant 1.000000e+00 : f32
    %168 = vector.broadcast %cst_31 : f32 to vector<8x128xf32>
    %169 = arith.addf %168, %167 : vector<8x128xf32>
    %170 = arith.divf %168, %169 : vector<8x128xf32>
    %171 = vector.extract_strided_slice %170 {offsets = [0, 0], sizes = [8, 64], strides = [1, 1]} : vector<8x128xf32> to vector<8x64xf32>
    %172 = vector.extract_strided_slice %170 {offsets = [0, 64], sizes = [8, 64], strides = [1, 1]} : vector<8x128xf32> to vector<8x64xf32>
    %173 = vector.extract_strided_slice %164 {offsets = [0, 128], sizes = [8, 64], strides = [1, 1]} : vector<8x256xf32> to vector<8x64xf32>
    %174 = math.tanh %173 : vector<8x64xf32>
    %175 = vector.extract_strided_slice %164 {offsets = [0, 192], sizes = [8, 64], strides = [1, 1]} : vector<8x256xf32> to vector<8x64xf32>
    %176 = arith.negf %175 : vector<8x64xf32>
    %177 = math.exp %176 : vector<8x64xf32>
    %cst_32 = arith.constant 1.000000e+00 : f32
    %178 = vector.broadcast %cst_32 : f32 to vector<8x64xf32>
    %179 = arith.addf %178, %177 : vector<8x64xf32>
    %180 = arith.divf %178, %179 : vector<8x64xf32>
    %181 = arith.mulf %172, %158 : vector<8x64xf32>
    %182 = arith.mulf %171, %174 : vector<8x64xf32>
    %183 = arith.addf %181, %182 : vector<8x64xf32>
    %184 = math.tanh %183 : vector<8x64xf32>
    %185 = arith.mulf %180, %184 : vector<8x64xf32>
    %186 = vector.extract_strided_slice %7 {offsets = [56, 0], sizes = [8, 256], strides = [1, 1]} : vector<64x256xf32> to vector<8x256xf32>
    %187 = arith.truncf %185 : vector<8x64xf32> to vector<8x64xbf16>
    %cst_33 = arith.constant dense<0.000000e+00> : vector<8x256xf32>
    %188 = tpu.matmul %187, %8, %cst_33 {dimension_numbers = #tpu.dot_dimension_numbers<[1], [0], [0], [1], [0, 0, 1, 1], [], []>} : vector<8x64xbf16>, vector<64x256xbf16>, vector<8x256xf32> -> vector<8x256xf32>
    %189 = arith.addf %186, %188 : vector<8x256xf32>
    %190 = vector.extract_strided_slice %189 {offsets = [0, 0], sizes = [8, 128], strides = [1, 1]} : vector<8x256xf32> to vector<8x128xf32>
    %191 = arith.negf %190 : vector<8x128xf32>
    %192 = math.exp %191 : vector<8x128xf32>
    %cst_34 = arith.constant 1.000000e+00 : f32
    %193 = vector.broadcast %cst_34 : f32 to vector<8x128xf32>
    %194 = arith.addf %193, %192 : vector<8x128xf32>
    %195 = arith.divf %193, %194 : vector<8x128xf32>
    %196 = vector.extract_strided_slice %195 {offsets = [0, 0], sizes = [8, 64], strides = [1, 1]} : vector<8x128xf32> to vector<8x64xf32>
    %197 = vector.extract_strided_slice %195 {offsets = [0, 64], sizes = [8, 64], strides = [1, 1]} : vector<8x128xf32> to vector<8x64xf32>
    %198 = vector.extract_strided_slice %189 {offsets = [0, 128], sizes = [8, 64], strides = [1, 1]} : vector<8x256xf32> to vector<8x64xf32>
    %199 = math.tanh %198 : vector<8x64xf32>
    %200 = vector.extract_strided_slice %189 {offsets = [0, 192], sizes = [8, 64], strides = [1, 1]} : vector<8x256xf32> to vector<8x64xf32>
    %201 = arith.negf %200 : vector<8x64xf32>
    %202 = math.exp %201 : vector<8x64xf32>
    %cst_35 = arith.constant 1.000000e+00 : f32
    %203 = vector.broadcast %cst_35 : f32 to vector<8x64xf32>
    %204 = arith.addf %203, %202 : vector<8x64xf32>
    %205 = arith.divf %203, %204 : vector<8x64xf32>
    %206 = arith.mulf %197, %183 : vector<8x64xf32>
    %207 = arith.mulf %196, %199 : vector<8x64xf32>
    %208 = arith.addf %206, %207 : vector<8x64xf32>
    %209 = math.tanh %208 : vector<8x64xf32>
    %210 = arith.mulf %205, %209 : vector<8x64xf32>
    %211 = tpu.iota {dimensions = array<i32: 1>} : vector<8x64xi32>
    %c32_i32 = arith.constant 32 : i32
    %212 = vector.broadcast %c32_i32 : i32 to vector<8x64xi32>
    %213 = arith.cmpi slt, %211, %212 : vector<8x64xi32>
    %214 = arith.select %213, %35, %210 : vector<8x64xi1>, vector<8x64xf32>
    %215 = arith.select %213, %60, %185 : vector<8x64xi1>, vector<8x64xf32>
    %216 = arith.select %213, %85, %160 : vector<8x64xi1>, vector<8x64xf32>
    %217 = arith.select %213, %110, %135 : vector<8x64xi1>, vector<8x64xf32>
    %218 = arith.select %213, %135, %110 : vector<8x64xi1>, vector<8x64xf32>
    %219 = arith.select %213, %160, %85 : vector<8x64xi1>, vector<8x64xf32>
    %220 = arith.select %213, %185, %60 : vector<8x64xi1>, vector<8x64xf32>
    %221 = arith.select %213, %210, %35 : vector<8x64xi1>, vector<8x64xf32>
    %222 = tpu.concatenate %214, %215, %216, %217, %218, %219, %220, %221 in 0 : vector<8x64xf32>, vector<8x64xf32>, vector<8x64xf32>, vector<8x64xf32>, vector<8x64xf32>, vector<8x64xf32>, vector<8x64xf32>, vector<8x64xf32> -> vector<64x64xf32>
    %223 = vector.shape_cast %222 : vector<64x64xf32> to vector<8x8x64xf32>
    %224 = arith.truncf %222 : vector<64x64xf32> to vector<64x64xbf16>
    %c0_36 = arith.constant 0 : index
    %c0_37 = arith.constant 0 : index
    %225 = vector.load %arg6[%c0_36, %c0_37] : memref<64x128xbf16, #tpu.memory_space<vmem>>, vector<64x128xbf16>
    %cst_38 = arith.constant dense<0.000000e+00> : vector<64x128xf32>
    %226 = tpu.matmul %224, %225, %cst_38 {dimension_numbers = #tpu.dot_dimension_numbers<[1], [0], [0], [1], [0, 0, 1, 1], [], []>} : vector<64x64xbf16>, vector<64x128xbf16>, vector<64x128xf32> -> vector<64x128xf32>
    %c0_39 = arith.constant 0 : index
    %c0_40 = arith.constant 0 : index
    %227 = vector.load %arg7[%c0_39, %c0_40] : memref<1x128xf32, #tpu.memory_space<vmem>>, vector<1x128xf32>
    %228 = vector.broadcast %227 : vector<1x128xf32> to vector<64x128xf32>
    %229 = arith.addf %226, %228 : vector<64x128xf32>
    %230 = math.tanh %229 : vector<64x128xf32>
    %231 = vector.shape_cast %230 : vector<64x128xf32> to vector<8x8x128xf32>
    %c0_41 = arith.constant 0 : index
    %c0_42 = arith.constant 0 : index
    %232 = vector.load %arg8[%c0_41, %c0_42] : memref<1x128xf32, #tpu.memory_space<vmem>>, vector<1x128xf32>
    %233 = vector.shape_cast %232 : vector<1x128xf32> to vector<1x1x128xf32>
    %234 = vector.broadcast %233 : vector<1x1x128xf32> to vector<8x8x128xf32>
    %235 = arith.mulf %231, %234 : vector<8x8x128xf32>
    %cst_43 = arith.constant dense<0.000000e+00> : vector<8x8xf32>
    %236 = vector.multi_reduction <add>, %235, %cst_43 [2] : vector<8x8x128xf32> to vector<8x8xf32>
    %237 = tpu.iota {dimensions = array<i32: 1>} : vector<8x8xi32>
    %c2_i32 = arith.constant 2 : i32
    %238 = vector.broadcast %c2_i32 : i32 to vector<8x8xi32>
    %239 = arith.cmpi slt, %237, %238 : vector<8x8xi32>
    %cst_44 = arith.constant -1.000000e+30 : f32
    %240 = vector.broadcast %cst_44 : f32 to vector<8x8xf32>
    %241 = arith.select %239, %236, %240 : vector<8x8xi1>, vector<8x8xf32>
    %cst_45 = arith.constant dense<0xFF800000> : vector<8xf32>
    %242 = vector.multi_reduction <maximumf>, %241, %cst_45 [1] : vector<8x8xf32> to vector<8xf32>
    %243 = vector.shape_cast %242 : vector<8xf32> to vector<8x1xf32>
    %244 = vector.broadcast %243 : vector<8x1xf32> to vector<8x8xf32>
    %245 = arith.subf %241, %244 : vector<8x8xf32>
    %246 = math.exp %245 : vector<8x8xf32>
    %cst_46 = arith.constant dense<0.000000e+00> : vector<8xf32>
    %247 = vector.multi_reduction <add>, %246, %cst_46 [1] : vector<8x8xf32> to vector<8xf32>
    %248 = vector.shape_cast %247 : vector<8xf32> to vector<8x1xf32>
    %249 = tpu.reciprocal %248 {approx = true} : vector<8x1xf32> -> vector<8x1xf32>
    %250 = vector.broadcast %249 : vector<8x1xf32> to vector<8x8xf32>
    %251 = arith.mulf %246, %250 : vector<8x8xf32>
    %252 = vector.shape_cast %251 : vector<8x8xf32> to vector<8x8x1xf32>
    %253 = vector.broadcast %252 : vector<8x8x1xf32> to vector<8x8x64xf32>
    %254 = arith.mulf %223, %253 : vector<8x8x64xf32>
    %cst_47 = arith.constant dense<0.000000e+00> : vector<8x64xf32>
    %255 = vector.multi_reduction <add>, %254, %cst_47 [0] : vector<8x8x64xf32> to vector<8x64xf32>
    %256 = arith.truncf %255 : vector<8x64xf32> to vector<8x64xbf16>
    %c0_48 = arith.constant 0 : index
    %c0_49 = arith.constant 0 : index
    %257 = vector.load %arg9[%c0_48, %c0_49] : memref<64x128xbf16, #tpu.memory_space<vmem>>, vector<64x128xbf16>
    %cst_50 = arith.constant dense<0.000000e+00> : vector<8x128xf32>
    %258 = tpu.matmul %256, %257, %cst_50 {dimension_numbers = #tpu.dot_dimension_numbers<[1], [0], [0], [1], [0, 0, 1, 1], [], []>} : vector<8x64xbf16>, vector<64x128xbf16>, vector<8x128xf32> -> vector<8x128xf32>
    %c0_51 = arith.constant 0 : index
    %c0_52 = arith.constant 0 : index
    %259 = vector.load %arg10[%c0_51, %c0_52] : memref<1x128xf32, #tpu.memory_space<vmem>>, vector<1x128xf32>
    %260 = vector.broadcast %259 : vector<1x128xf32> to vector<8x128xf32>
    %261 = arith.addf %258, %260 : vector<8x128xf32>
    %c0_53 = arith.constant 0 : index
    %c0_54 = arith.constant 0 : index
    %262 = vector.load %arg11[%c0_53, %c0_54] : memref<8x128xf32, #tpu.memory_space<vmem>>, vector<8x128xf32>
    tpu.vector_store %arg11[%c0_53, %c0_54], %261 {strides = array<i32>} : memref<8x128xf32, #tpu.memory_space<vmem>>, vector<8x128xf32>,
    return
  }
}

</mosaic_0001>

<bundles_post_ra>
// kernel: rnn_forward_pallas.1
= control target key start
LH: loop header
LB: loop body
LE: loop exit
PB: predicated region body
PF: predicated region fallthrough
CT: control target
= control target key end

     0   :  { %vm105_vm0 = vcmask 261120   ;;  %s1506_s23 = smov 64   ;;  %vm227_vm1 = vcmask 523264   ;;  %s2012_s3 = inlined_call_operand.vmem [shape: bf16[32,256], index: 3, kind: input, shape index: {}]   ;;  %s2013_s0 = inlined_call_operand.vmem [shape: f32[8,8,32], index: 0, kind: input, shape index: {}]   ;;  %s2014_s4 = inlined_call_operand.vmem [shape: bf16[64,256], index: 4, kind: input, shape index: {}]   ;;  %s2015_s2 = inlined_call_operand.vmem [shape: f32[8,64], index: 2, kind: input, shape index: {}]   ;;  %s2016_s1 = inlined_call_operand.vmem [shape: f32[8,64], index: 1, kind: input, shape index: {}]   ;;  %s2017_s5 = inlined_call_operand.vmem [shape: f32[1,256], index: 5, kind: input, shape index: {}]   ;;  %s2018_s6 = inlined_call_operand.vmem [shape: bf16[64,128], index: 6, kind: input, shape index: {}]   ;;  %s2019_s7 = inlined_call_operand.vmem [shape: f32[1,128], index: 7, kind: input, shape index: {}]   ;;  %s2020_s8 = inlined_call_operand.vmem [shape: f32[1,128], index: 8, kind: input, shape index: {}]   ;;  %s2021_s10 = inlined_call_operand.vmem [shape: f32[1,128], index: 10, kind: input, shape index: {}]   ;;  %s2022_s9 = inlined_call_operand.vmem [shape: bf16[64,128], index: 9, kind: input, shape index: {}]   ;;  %s2023_s11 = inlined_call_operand.vmem [shape: f32[8,128], index: 11, kind: output, shape index: {}]  }
   0x1   :  { %v1244_v0 = vld [vmem:[%s2012_s3 + $0x10] sm:$0xf]  ;;  %v1362_v1 = vld [vmem:[%s2012_s3 + $0x14] sm:$0xf0]  ;;  %v1236_v2 = vld [vmem:[%s2012_s3] sm:$0xf] }
   0x2   :  { %v1245_v3 = vor.u32 %v1362_v1, %v1244_v0  ;;  %v1360_v4 = vld [vmem:[%s2012_s3 + $0x4] sm:$0xf0]  ;;  %v41_v5 = vld [vmem:[%s2013_s0 + $0x10] sm:$0xff]  ;;  %v42_v6 = vld [vmem:[%s2013_s0 + $0x18] sm:$0xff] }
   0x3   :  { %v49_v7 = vpack.c.bf16 %v41_v5, %v41_v5  ;;  %v50_v8 = vpack.c.bf16 %v42_v6, %v42_v6  ;;  %v1284_v9 = vld [vmem:[%s2014_s4 + $0x30] sm:$0xf]  ;;  %v1370_v10 = vld [vmem:[%s2014_s4 + $0x34] sm:$0xf0]  ;;  %v1237_v11 = vor.u32 %v1360_v4, %v1236_v2  ;;  %v1276_v16 = vld [vmem:[%s2014_s4 + $0x20] sm:$0xf] }
   0x4   :  { %1379 = vmatpush.bf16.msra.mxu2 %v1245_v3  ;;  %1380 = vmatpush.bf16.msra.mxu3 %v1245_v3  ;;  %v1591_v14 = vor.u32 %v1370_v10, %v1284_v9  ;;  %v45_v15 = vld [vmem:[%s2013_s0 + $0x30] sm:$0xff]  ;;  %v1368_v17 = vld [vmem:[%s2014_s4 + $0x24] sm:$0xf0]  ;;  %v46_v18 = vld [vmem:[%s2013_s0 + $0x38] sm:$0xff] }
   0x5   :  { %v75_v12 = vunpack.c.l.b16 %v49_v7  ;;  %v76_v13 = vunpack.c.l.b16 %v50_v8  ;;  %124 = vmatpush.bf16.msra.mxu0 %v1245_v3  ;;  %v53_v19 = vpack.c.bf16 %v45_v15, %v45_v15  ;;  %v54_v21 = vpack.c.bf16 %v46_v18, %v46_v18  ;;  %v1369_v22 = vld [vmem:[%s2014_s4 + $0x34] sm:$0xf]  ;;  %v1286_v23 = vld [vmem:[%s2014_s4 + $0x38] sm:$0xf0]  ;;  %v39_v24 = vld [vmem:[%s2013_s0] sm:$0xff] }
   0x6   :  { %v1616_v26 = vor.u32 %v1369_v22, %v1286_v23  ;;  %v40_v27 = vld [vmem:[%s2013_s0 + $0x8] sm:$0xff]  ;;  %v47_v28 = vpack.c.bf16 %v39_v24, %v39_v24  ;;  %v1367_v29 = vld [vmem:[%s2014_s4 + $0x24] sm:$0xf]  ;;  %v1628_v31 = vor.u32 %v1368_v17, %v1276_v16  ;;  %v1268_v35 = vld [vmem:[%s2014_s4 + $0x10] sm:$0xf] }
   0x7   :  { %v1605_v20 = vpack.c.b16 %v76_v13, %v75_v12  ;;  %v79_v25 = vunpack.c.l.b16 %v53_v19  ;;  %v1278_v30 = vld [vmem:[%s2014_s4 + $0x28] sm:$0xf0]  ;;  %v80_v32 = vunpack.c.l.b16 %v54_v21  ;;  %v48_v33 = vpack.c.bf16 %v40_v27, %v40_v27  ;;  %v43_v34 = vld [vmem:[%s2013_s0 + $0x20] sm:$0xff]  ;;  %v1366_v36 = vld [vmem:[%s2014_s4 + $0x14] sm:$0xf0] }
   0x8   :  { %1381 = vmatpush.bf16.msra.mxu2 %v1237_v11  ;;  %1382 = vmatpush.bf16.msra.mxu3 %v1237_v11  ;;  %v73_v37 = vunpack.c.l.b16 %v47_v28  ;;  %v1640_v38 = vor.u32 %v1367_v29, %v1278_v30  ;;  %v1365_v39 = vld [vmem:[%s2014_s4 + $0x14] sm:$0xf]  ;;  %v1270_v42 = vld [vmem:[%s2014_s4 + $0x18] sm:$0xf0]  ;;  %v44_v45 = vld [vmem:[%s2013_s0 + $0x28] sm:$0xff]  ;;  %v1669_v49 = vor.u32 %v1366_v36, %v1268_v35  ;;  %v51_v56 = vpack.c.bf16 %v43_v34, %v43_v34 }
   0x9   :  { %125 = vmatpush.bf16.msra.mxu0 %v1237_v11  ;;  %v1648_v40 = vpack.c.b16 %v80_v32, %v79_v25  ;;  %v74_v41 = vunpack.c.l.b16 %v48_v33  ;;  %v1361_v43 = vld [vmem:[%s2012_s3 + $0x14] sm:$0xf]  ;;  %v1246_v44 = vld [vmem:[%s2012_s3 + $0x18] sm:$0xf0]  ;;  %v1359_v47 = vld [vmem:[%s2012_s3 + $0x4] sm:$0xf]  ;;  %v1683_v54 = vor.u32 %v1365_v39, %v1270_v42  ;;  %v52_v57 = vpack.c.bf16 %v44_v45, %v44_v45 }
   0xa   :  { %v1249_v46 = vor.u32 %v1361_v43, %v1246_v44  ;;  %v1238_v48 = vld [vmem:[%s2012_s3 + $0x8] sm:$0xf0]  ;;  %v185_v51 = vld [vmem:[%s2015_s2] sm:$0xff]  ;;  %v1364_v53 = vld [vmem:[%s2014_s4 + $0x4] sm:$0xf0]  ;;  %v77_v62 = vunpack.c.l.b16 %v51_v56 }
   0xb   :  { %1251 = vmatmul.msk.bf16.vlgmr.msra.gmra.mxu2 %vm105_vm0, %v1605_v20  ;;  %1253 = vmatmul.msk.bf16.vlgmr.msra.gmra.mxu3 %vm105_vm0, %v1648_v40  ;;  %v81_v50 = vpack.c.b16 %v74_v41, %v73_v37  ;;  %v1260_v52 = vld [vmem:[%s2014_s4] sm:$0xf]  ;;  %v1241_v55 = vor.u32 %v1359_v47, %v1238_v48  ;;  %v1363_v58 = vld [vmem:[%s2014_s4 + $0x4] sm:$0xf]  ;;  %v1262_v59 = vld [vmem:[%s2014_s4 + $0x8] sm:$0xf0]  ;;  %v78_v63 = vunpack.c.l.b16 %v52_v57 }
   0xc   :  { %235 = vmatpush.bf16.msrb.mxu2 %v1591_v14  ;;  %248 = vmatpush.bf16.msrb.mxu3 %v1616_v26  ;;  %v1695_v60 = vor.u32 %v1364_v53, %v1260_v52  ;;  %v1698_v61 = vor.u32 %v1363_v58, %v1262_v59  ;;  %v184_v1 = vld [vmem:[%s2016_s1] sm:$0xff] }
   0xd   :  { %571 = vmatpush.bf16.msrb.mxu0 %v1591_v14  ;;  %153 = vmatpush.bf16.msra.mxu1 %v1249_v46  ;;  %v83_v0 = vpack.c.b16 %v78_v63, %v77_v62  ;;  %v186_v2 = vpack.c.bf16 %v184_v1, %v184_v1  ;;  %v59_v3 = vld [vmem:[%s2017_s5] sm:$0x3] }
   0xe   :  { %1250 = vmatmul.msk.bf16.vlgmr.msra.gmra.mxu0 %vm105_vm0, %v81_v50  ;;  %299 = vrot.lane.b32.xlu0 %v185_v51, %s1506_s23  ;;  %v1747_v4 = vperm.slane %v59_v3, 0  ;;  %v1768_v29 = vperm.slane %v59_v3, 1 }
  0x10   :  { %236 = vmatpush.bf16.msrb.mxu2 %v1628_v31  ;;  %249 = vmatpush.bf16.msrb.mxu3 %v1640_v38 }
  0x11   :  { %572 = vmatpush.bf16.msrb.mxu0 %v1628_v31  ;;  %154 = vmatpush.bf16.msra.mxu1 %v1241_v55 }
  0x14   :  { %237 = vmatpush.bf16.msrb.mxu2 %v1669_v49  ;;  %250 = vmatpush.bf16.msrb.mxu3 %v1683_v54 }
  0x15   :  { %584 = vmatpush.bf16.msrb.mxu1 %v1616_v26  ;;  %573 = vmatpush.bf16.msrb.mxu0 %v1669_v49 }
  0x16   :  { %1254 = vmatmul.msk.bf16.vlgmr.msra.gmra.mxu1 %vm105_vm0, %v81_v50 }
  0x18   :  { %238 = vmatpush.bf16.msrb.mxu2 %v1695_v60  ;;  %251 = vmatpush.bf16.msrb.mxu3 %v1698_v61 }
  0x19   :  { %585 = vmatpush.bf16.msrb.mxu1 %v1640_v38  ;;  %574 = vmatpush.bf16.msrb.mxu0 %v1695_v60 }
  0x1b   :  { %1252 = vmatmul.msk.bf16.gmra.mxu2 %vm105_vm0, %v83_v0  ;;  %1291 = vmatmul.msk.bf16.vlgmr.msrb.gmra.mxu3 %vm227_vm1, %v186_v2 }
  0x1c   :  { %322 = vmatpush.bf16.msra.mxu2 %v1591_v14  ;;  %335 = vmatpush.bf16.msra.mxu3 %v1616_v26 }
  0x1d   :  { %737 = vmatpush.bf16.msra.mxu0 %v1591_v14  ;;  %586 = vmatpush.bf16.msrb.mxu1 %v1683_v54 }
  0x20   :  { %323 = vmatpush.bf16.msra.mxu2 %v1628_v31  ;;  %336 = vmatpush.bf16.msra.mxu3 %v1640_v38 }
  0x21   :  { %738 = vmatpush.bf16.msra.mxu0 %v1628_v31  ;;  %587 = vmatpush.bf16.msrb.mxu1 %v1698_v61 }
  0x24   :  { %324 = vmatpush.bf16.msra.mxu2 %v1669_v49  ;;  %337 = vmatpush.bf16.msra.mxu3 %v1683_v54 }
  0x25   :  { %750 = vmatpush.bf16.msra.mxu1 %v1616_v26  ;;  %739 = vmatpush.bf16.msra.mxu0 %v1669_v49 }
  0x26   :  { %1255 = vmatmul.msk.bf16.gmra.mxu1 %vm105_vm0, %v1605_v20 }
  0x28   :  { %325 = vmatpush.bf16.msra.mxu2 %v1695_v60  ;;  %338 = vmatpush.bf16.msra.mxu3 %v1698_v61 }
  0x29   :  { %740 = vmatpush.bf16.msra.mxu0 %v1695_v60  ;;  %751 = vmatpush.bf16.msra.mxu1 %v1640_v38 }
  0x2b   :  { %1290 = vmatmul.msk.bf16.vlgmr.msrb.gmra.mxu2 %vm227_vm1, %v186_v2 }
  0x2c   :  { %418 = vmatpush.bf16.msrb.mxu3 %v1616_v26  ;;  %405 = vmatpush.bf16.msrb.mxu2 %v1591_v14 }
  0x2d   :  { %752 = vmatpush.bf16.msra.mxu1 %v1683_v54 }
  0x30   :  { %419 = vmatpush.bf16.msrb.mxu3 %v1640_v38  ;;  %406 = vmatpush.bf16.msrb.mxu2 %v1628_v31 }
  0x31   :  { %753 = vmatpush.bf16.msra.mxu1 %v1698_v61 }
  0x34   :  { %420 = vmatpush.bf16.msrb.mxu3 %v1683_v54  ;;  %407 = vmatpush.bf16.msrb.mxu2 %v1669_v49 }
  0x36   :  { %1256 = vmatmul.msk.bf16.gmra.mxu1 %vm105_vm0, %v83_v0 }
  0x38   :  { %421 = vmatpush.bf16.msrb.mxu3 %v1698_v61  ;;  %408 = vmatpush.bf16.msrb.mxu2 %v1695_v60 }
  0x46   :  { %1257 = vmatmul.msk.bf16.gmra.mxu1 %vm105_vm0, %v1648_v40 }
  0x80   :  { %v300_v53 = vpop.permute.xlu0 %299 }
  0x8b   :  { %v127_v20 = vpop.f32.mrf.mxu0 }
  0x8c   :  { %v128_v21 = vadd.f32 %v127_v20, %v1747_v4 }
  0x8e   :  { %v132_v5 = vpop.f32.mrf.mxu2  ;;  %v142_v7 = vpop.f32.mrf.mxu3 }
  0x8f   :  { %v1750_v6 = vadd.f32 %v132_v5, %v1747_v4  ;;  %v1753_v8 = vadd.f32 %v142_v7, %v1747_v4 }
  0x93   :  { %v156_v30 = vpop.f32.mrf.mxu1 }
  0x94   :  { %v157_v32 = vadd.f32 %v156_v30, %v1768_v29 }
  0x96   :  { %v134_v9 = vpop.f32.mrf.mxu2  ;;  %v144_v11 = vpop.f32.mrf.mxu3 }
  0x97   :  { %v1756_v10 = vadd.f32 %v134_v9, %v1747_v4  ;;  %v1759_v12 = vadd.f32 %v144_v11, %v1747_v4 }
  0x9e   :  { %v137_v13 = vpop.f32.mrf.mxu2  ;;  %v253_v16 = vpop.f32.mrf.mxu3 }
  0x9f   :  { %v1762_v15 = vadd.f32 %v137_v13, %v1747_v4  ;;  %v258_v34 = vadd.f32 %v253_v16, %v157_v32  ;;  %v129_v13 = vpop.f32.mrf.mxu0 }
  0xa0   :  { %v130_v16 = vadd.f32 %v129_v13, %v1747_v4 }
  0xa1   :  { %v1293_v47 = vmul.f32 -1.442695, %v258_v34 }
  0xa6   :  { %v139_v17 = vpop.f32.mrf.mxu2  ;;  %v255_v19 = vpop.f32.mrf.mxu3 }
  0xa7   :  { %v1765_v18 = vadd.f32 %v139_v17, %v1747_v4 }
  0xae   :  { %v240_v22 = vpop.f32.mrf.mxu2 }
  0xaf   :  { %v257_v23 = vadd.f32 %v240_v22, %v128_v21 }
  0xb1   :  { %v1292_v24 = vmul.f32 -1.442695, %v257_v23 }
  0xb3   :  { %1390 = vpow2.f32 %v1292_v24 }
  0xb6   :  { %v242_v25 = vpop.f32.mrf.mxu2 }
  0xb9   :  { %v1391_v27 = vpop.eup %1390 }
  0xba   :  { %v262_v28 = vadd.f32 1.0, %v1391_v27  ;;  %v158_v27 = vpop.f32.mrf.mxu1 }
  0xbc   :  { %1392 = vrcp.f32 %v262_v28  ;;  %v274_v37 = vand.u32 2147483648, %v262_v28  ;;  %v272_v40 = vand.u32 2147483647, %v262_v28  ;;  %vm268_vm3 = vweird.f32 %v262_v28 }
  0xbd   :  { %1394 = vtanh.f32 %v258_v34 }
  0xbe   :  { %v275_v43 = vor.u32 1.1754944e-38, %v274_v37  ;;  %vm273_vm5 = vcmp.eq.f32.partialorder %v272_v40, 8.507059e+37  ;;  %1396 = vpow2.f32 %v1293_v47 }
  0xc2   :  { %v1393_v33 = vpop.eup %1392 }
  0xc3   :  { %v264_v35 = vmul.f32 %v1393_v33, %v262_v28  ;;  %vm269_vm2 = vweird.f32 %v1393_v33  ;;  %v1395_v42 = vpop.eup %1394  ;;  %v159_v28 = vadd.f32 %v158_v27, %v1768_v29 }
  0xc4   :  { %vm270_vm4 = vmor %vm268_vm3, %vm269_vm2  ;;  %v1397_v48 = vpop.eup %1396 }
  0xc5   :  { %v265_v36 = vsub.f32 1.0, %v264_v35  ;;  %v282_v50 = vadd.f32 1.0, %v1397_v48 }
  0xc7   :  { %v266_v39 = vmul.f32 %v1393_v33, %v265_v36  ;;  %1398 = vrcp.f32 %v282_v50  ;;  %vm288_vm6 = vweird.f32 %v282_v50  ;;  %v294_v62 = vand.u32 2147483648, %v282_v50 }
  0xc8   :  { %v292_v0 = vand.u32 2147483647, %v282_v50 }
  0xc9   :  { %v267_v41 = vadd.f32 %v1393_v33, %v266_v39  ;;  %v295_v1 = vor.u32 1.1754944e-38, %v294_v62 }
  0xca   :  { %vm293_vm9 = vcmp.eq.f32.partialorder %v292_v0, 8.507059e+37 }
  0xcb   :  { %v271_v44 = vsel %vm270_vm4, %v1393_v33, %v267_v41 }
  0xcc   :  { %v276_v45 = vsel %vm273_vm5, %v275_v43, %v271_v44 }
  0xcd   :  { %v303_v46 = vmul.f32 %v1395_v42, %v276_v45  ;;  %v1399_v51 = vpop.eup %1398  ;;  %v302_v57 = vmul.f32 %v300_v53, %v276_v45 }
  0xce   :  { %v284_v52 = vmul.f32 %v1399_v51, %v282_v50  ;;  %vm289_vm7 = vweird.f32 %v1399_v51 }
  0xcf   :  { %305 = vrot.lane.b32.xlu0 %v303_v46, %s1506_s23  ;;  %vm290_vm8 = vmor %vm288_vm6, %vm289_vm7 }
  0xd0   :  { %v285_v55 = vsub.f32 1.0, %v284_v52 }
  0xd2   :  { %v286_v56 = vmul.f32 %v1399_v51, %v285_v55 }
  0xd4   :  { %v287_v63 = vadd.f32 %v1399_v51, %v286_v56 }
  0xd6   :  { %v291_v2 = vsel %vm290_vm8, %v1399_v51, %v287_v63 }
  0xd7   :  { %v296_v5 = vsel %vm293_vm9, %v295_v1, %v291_v2 }
 0x141   :  { %v306_v58 = vpop.permute.xlu0 %305 }
 0x142   :  { %v1772_v59 = vadd.f32 %v306_v58, %v302_v57 }
 0x144   :  { %1400 = vtanh.f32 %v1772_v59 }
 0x14a   :  { %v1401_v3 = vpop.eup %1400 }
 0x14b   :  { %v1775_v7 = vmul.f32 %v1401_v3, %v296_v5 }
 0x14d   :  { %v311_v9 = vpack.c.bf16 %v1775_v7, %v1775_v7 }
 0x14f   :  { %313 = vrot.lane.b32.xlu1 %v311_v9, %s1506_s23 }
 0x1c1   :  { %v314_v11 = vpop.permute.xlu1 %313 }
 0x1c2   :  { %1294 = vmatmul.msk.bf16.vlgmr.msra.gmra.mxu2 %vm227_vm1, %v314_v11  ;;  %1295 = vmatmul.msk.bf16.vlgmr.msra.gmra.mxu3 %vm227_vm1, %v314_v11 }
 0x1c3   :  { %488 = vmatpush.bf16.msra.mxu2 %v1591_v14  ;;  %501 = vmatpush.bf16.msra.mxu3 %v1616_v26 }
 0x1c7   :  { %489 = vmatpush.bf16.msra.mxu2 %v1628_v31  ;;  %502 = vmatpush.bf16.msra.mxu3 %v1640_v38 }
 0x1cb   :  { %490 = vmatpush.bf16.msra.mxu2 %v1669_v49  ;;  %503 = vmatpush.bf16.msra.mxu3 %v1683_v54 }
 0x1cf   :  { %491 = vmatpush.bf16.msra.mxu2 %v1695_v60  ;;  %504 = vmatpush.bf16.msra.mxu3 %v1698_v61 }
 0x245   :  { %v327_v17 = vpop.f32.mrf.mxu2  ;;  %v340_v19 = vpop.f32.mrf.mxu3 }
 0x246   :  { %v344_v20 = vadd.f32 %v327_v17, %v130_v16  ;;  %v345_v32 = vadd.f32 %v340_v19, %v159_v28 }
 0x248   :  { %v1296_v21 = vmul.f32 -1.442695, %v344_v20  ;;  %v1297_v44 = vmul.f32 -1.442695, %v345_v32 }
 0x24a   :  { %1402 = vpow2.f32 %v1296_v21  ;;  %v161_v21 = vpop.f32.mrf.mxu1 }
 0x24d   :  { %v329_v22 = vpop.f32.mrf.mxu2  ;;  %v342_v23 = vpop.f32.mrf.mxu3 }
 0x24e   :  { %v162_v22 = vadd.f32 %v161_v21, %v1768_v29 }
 0x250   :  { %v1403_v24 = vpop.eup %1402 }
 0x251   :  { %v349_v25 = vadd.f32 1.0, %v1403_v24 }
 0x253   :  { %1404 = vrcp.f32 %v349_v25  ;;  %v361_v35 = vand.u32 2147483648, %v349_v25  ;;  %v359_v36 = vand.u32 2147483647, %v349_v25  ;;  %vm355_vm11 = vweird.f32 %v349_v25 }
 0x254   :  { %1406 = vtanh.f32 %v345_v32 }
 0x255   :  { %v362_v39 = vor.u32 1.1754944e-38, %v361_v35  ;;  %vm360_vm13 = vcmp.eq.f32.partialorder %v359_v36, 8.507059e+37  ;;  %1408 = vpow2.f32 %v1297_v44 }
 0x259   :  { %v1405_v30 = vpop.eup %1404 }
 0x25a   :  { %v351_v33 = vmul.f32 %v1405_v30, %v349_v25  ;;  %vm356_vm10 = vweird.f32 %v1405_v30  ;;  %v1407_v41 = vpop.eup %1406 }
 0x25b   :  { %vm357_vm12 = vmor %vm355_vm11, %vm356_vm10  ;;  %v1409_v45 = vpop.eup %1408 }
 0x25c   :  { %v352_v34 = vsub.f32 1.0, %v351_v33  ;;  %v369_v46 = vadd.f32 1.0, %v1409_v45 }
 0x25e   :  { %v353_v4 = vmul.f32 %v1405_v30, %v352_v34  ;;  %1410 = vrcp.f32 %v369_v46  ;;  %v381_v57 = vand.u32 2147483648, %v369_v46  ;;  %vm375_vm15 = vweird.f32 %v369_v46 }
 0x25f   :  { %v379_v58 = vand.u32 2147483647, %v369_v46 }
 0x260   :  { %v354_v37 = vadd.f32 %v1405_v30, %v353_v4  ;;  %v382_v63 = vor.u32 1.1754944e-38, %v381_v57 }
 0x261   :  { %vm380_vm2 = vcmp.eq.f32.partialorder %v379_v58, 8.507059e+37 }
 0x262   :  { %v358_v40 = vsel %vm357_vm12, %v1405_v30, %v354_v37 }
 0x263   :  { %v363_v42 = vsel %vm360_vm13, %v362_v39, %v358_v40 }
 0x264   :  { %v386_v43 = vmul.f32 %v1407_v41, %v363_v42  ;;  %v1411_v47 = vpop.eup %1410  ;;  %v385_v52 = vmul.f32 %v363_v42, %v1772_v59 }
 0x265   :  { %v371_v48 = vmul.f32 %v1411_v47, %v369_v46  ;;  %vm376_vm14 = vweird.f32 %v1411_v47 }
 0x266   :  { %388 = vrot.lane.b32.xlu1 %v386_v43, %s1506_s23  ;;  %vm377_vm0 = vmor %vm375_vm15, %vm376_vm14 }
 0x267   :  { %v372_v50 = vsub.f32 1.0, %v371_v48 }
 0x269   :  { %v373_v51 = vmul.f32 %v1411_v47, %v372_v50 }
 0x26b   :  { %v374_v56 = vadd.f32 %v1411_v47, %v373_v51 }
 0x26d   :  { %v378_v62 = vsel %vm377_vm0, %v1411_v47, %v374_v56 }
 0x26e   :  { %v383_v1 = vsel %vm380_vm2, %v382_v63, %v378_v62 }
 0x2d8   :  { %v389_v53 = vpop.permute.xlu1 %388 }
 0x2d9   :  { %v1794_v55 = vadd.f32 %v389_v53, %v385_v52 }
 0x2db   :  { %1412 = vtanh.f32 %v1794_v55 }
 0x2e1   :  { %v1413_v0 = vpop.eup %1412 }
 0x2e2   :  { %v1797_v2 = vmul.f32 %v1413_v0, %v383_v1 }
 0x2e4   :  { %v394_v59 = vpack.c.bf16 %v1797_v2, %v1797_v2 }
 0x2e6   :  { %396 = vrot.lane.b32.xlu2 %v394_v59, %s1506_s23 }
 0x340   :  { %v397_v3 = vpop.permute.xlu2 %396 }
 0x341   :  { %1298 = vmatmul.msk.bf16.vlgmr.msrb.gmra.mxu2 %vm227_vm1, %v397_v3  ;;  %1299 = vmatmul.msk.bf16.vlgmr.msrb.gmra.mxu3 %vm227_vm1, %v397_v3 }
 0x342   :  { %654 = vmatpush.bf16.msrb.mxu2 %v1591_v14  ;;  %667 = vmatpush.bf16.msrb.mxu3 %v1616_v26 }
 0x346   :  { %655 = vmatpush.bf16.msrb.mxu2 %v1628_v31  ;;  %668 = vmatpush.bf16.msrb.mxu3 %v1640_v38 }
 0x34a   :  { %656 = vmatpush.bf16.msrb.mxu2 %v1669_v49  ;;  %669 = vmatpush.bf16.msrb.mxu3 %v1683_v54 }
 0x34e   :  { %657 = vmatpush.bf16.msrb.mxu2 %v1695_v60  ;;  %670 = vmatpush.bf16.msrb.mxu3 %v1698_v61 }
 0x3c4   :  { %v410_v5 = vpop.f32.mrf.mxu2  ;;  %v423_v9 = vpop.f32.mrf.mxu3 }
 0x3c5   :  { %v427_v11 = vadd.f32 %v410_v5, %v1750_v6  ;;  %v428_v24 = vadd.f32 %v423_v9, %v162_v22 }
 0x3c7   :  { %v1300_v13 = vmul.f32 -1.442695, %v427_v11  ;;  %v1301_v37 = vmul.f32 -1.442695, %v428_v24 }
 0x3c9   :  { %1414 = vpow2.f32 %v1300_v13 }
 0x3cc   :  { %v412_v16 = vpop.f32.mrf.mxu2  ;;  %v425_v17 = vpop.f32.mrf.mxu3 }
 0x3cf   :  { %v1415_v19 = vpop.eup %1414 }
 0x3d0   :  { %v432_v20 = vadd.f32 1.0, %v1415_v19 }
 0x3d2   :  { %1416 = vrcp.f32 %v432_v20  ;;  %v444_v28 = vand.u32 2147483648, %v432_v20  ;;  %v442_v32 = vand.u32 2147483647, %v432_v20  ;;  %vm438_vm4 = vweird.f32 %v432_v20 }
 0x3d3   :  { %1418 = vtanh.f32 %v428_v24 }
 0x3d4   :  { %v445_v33 = vor.u32 1.1754944e-38, %v444_v28  ;;  %vm443_vm6 = vcmp.eq.f32.partialorder %v442_v32, 8.507059e+37  ;;  %1420 = vpow2.f32 %v1301_v37 }
 0x3d8   :  { %v1417_v23 = vpop.eup %1416 }
 0x3d9   :  { %v434_v25 = vmul.f32 %v1417_v23, %v432_v20  ;;  %vm439_vm3 = vweird.f32 %v1417_v23  ;;  %v1419_v35 = vpop.eup %1418 }
 0x3da   :  { %vm440_vm5 = vmor %vm438_vm4, %vm439_vm3  ;;  %v1421_v39 = vpop.eup %1420 }
 0x3db   :  { %v435_v27 = vsub.f32 1.0, %v434_v25  ;;  %v452_v40 = vadd.f32 1.0, %v1421_v39 }
 0x3dd   :  { %v436_v30 = vmul.f32 %v1417_v23, %v435_v27  ;;  %1422 = vrcp.f32 %v452_v40  ;;  %v464_v50 = vand.u32 2147483648, %v452_v40  ;;  %vm458_vm8 = vweird.f32 %v452_v40 }
 0x3de   :  { %v462_v51 = vand.u32 2147483647, %v452_v40 }
 0x3df   :  { %v437_v6 = vadd.f32 %v1417_v23, %v436_v30  ;;  %v465_v53 = vor.u32 1.1754944e-38, %v464_v50 }
 0x3e0   :  { %vm463_vm10 = vcmp.eq.f32.partialorder %v462_v51, 8.507059e+37 }
 0x3e1   :  { %v441_v34 = vsel %vm440_vm5, %v1417_v23, %v437_v6 }
 0x3e2   :  { %v446_v4 = vsel %vm443_vm6, %v445_v33, %v441_v34 }
 0x3e3   :  { %v469_v36 = vmul.f32 %v1419_v35, %v446_v4  ;;  %v1423_v41 = vpop.eup %1422  ;;  %v468_v45 = vmul.f32 %v446_v4, %v1794_v55 }
 0x3e4   :  { %v454_v42 = vmul.f32 %v1423_v41, %v452_v40  ;;  %vm459_vm7 = vweird.f32 %v1423_v41 }
 0x3e5   :  { %471 = vrot.lane.b32.xlu2 %v469_v36, %s1506_s23  ;;  %vm460_vm9 = vmor %vm458_vm8, %vm459_vm7 }
 0x3e6   :  { %v455_v43 = vsub.f32 1.0, %v454_v42 }
 0x3e8   :  { %v456_v44 = vmul.f32 %v1423_v41, %v455_v43 }
 0x3ea   :  { %v457_v48 = vadd.f32 %v1423_v41, %v456_v44 }
 0x3ec   :  { %v461_v52 = vsel %vm460_vm9, %v1423_v41, %v457_v48 }
 0x3ed   :  { %v466_v57 = vsel %vm463_vm10, %v465_v53, %v461_v52 }
 0x43f   :  { %v472_v46 = vpop.permute.xlu2 %471 }
 0x440   :  { %v1816_v47 = vadd.f32 %v472_v46, %v468_v45 }
 0x442   :  { %1424 = vtanh.f32 %v1816_v47 }
 0x448   :  { %v1425_v56 = vpop.eup %1424 }
 0x449   :  { %v1819_v58 = vmul.f32 %v1425_v56, %v466_v57 }
 0x44b   :  { %v477_v55 = vpack.c.bf16 %v1819_v58, %v1819_v58 }
 0x44d   :  { %479 = vrot.lane.b32.xlu0 %v477_v55, %s1506_s23 }
 0x4bf   :  { %v480_v62 = vpop.permute.xlu0 %479 }
 0x4c0   :  { %1302 = vmatmul.msk.bf16.vlgmr.msra.gmra.mxu2 %vm227_vm1, %v480_v62  ;;  %1303 = vmatmul.msk.bf16.vlgmr.msra.gmra.mxu3 %vm227_vm1, %v480_v62 }
 0x4c1   :  { %820 = vmatpush.bf16.msra.mxu2 %v1591_v14  ;;  %833 = vmatpush.bf16.msra.mxu3 %v1616_v26 }
 0x4c5   :  { %821 = vmatpush.bf16.msra.mxu2 %v1628_v31  ;;  %834 = vmatpush.bf16.msra.mxu3 %v1640_v38  ;;  %v163_v38 = vpop.f32.mrf.mxu1 }
 0x4c9   :  { %822 = vmatpush.bf16.msra.mxu2 %v1669_v49  ;;  %835 = vmatpush.bf16.msra.mxu3 %v1683_v54  ;;  %v164_v49 = vadd.f32 %v163_v38, %v1768_v29 }
 0x4cd   :  { %823 = vmatpush.bf16.msra.mxu2 %v1695_v60  ;;  %836 = vmatpush.bf16.msra.mxu3 %v1698_v61  ;;  %v166_v44 = vpop.f32.mrf.mxu1 }
 0x4ce   :  { %v167_v62 = vadd.f32 %v166_v44, %v1768_v29 }
 0x4d5   :  { %v1845_v45 = vpop.f32.mrf.mxu1 }
 0x4dd   :  { %v1847_v46 = vpop.f32.mrf.mxu1 }
 0x543   :  { %v493_v63 = vpop.f32.mrf.mxu2  ;;  %v506_v0 = vpop.f32.mrf.mxu3 }
 0x544   :  { %v510_v1 = vadd.f32 %v493_v63, %v1756_v10  ;;  %v511_v54 = vadd.f32 %v506_v0, %v164_v49 }
 0x546   :  { %v1304_v59 = vmul.f32 -1.442695, %v510_v1  ;;  %v1305_v22 = vmul.f32 -1.442695, %v511_v54 }
 0x548   :  { %1426 = vpow2.f32 %v1304_v59 }
 0x54b   :  { %v495_v14 = vpop.f32.mrf.mxu2  ;;  %v508_v26 = vpop.f32.mrf.mxu3 }
 0x54e   :  { %v1427_v3 = vpop.eup %1426 }
 0x54f   :  { %v515_v31 = vadd.f32 1.0, %v1427_v3 }
 0x551   :  { %1428 = vrcp.f32 %v515_v31  ;;  %v527_v61 = vand.u32 2147483648, %v515_v31  ;;  %v525_v13 = vand.u32 2147483647, %v515_v31  ;;  %vm521_vm12 = vweird.f32 %v515_v31 }
 0x552   :  { %1430 = vtanh.f32 %v511_v54 }
 0x553   :  { %v528_v16 = vor.u32 1.1754944e-38, %v527_v61  ;;  %vm526_vm14 = vcmp.eq.f32.partialorder %v525_v13, 8.507059e+37  ;;  %1432 = vpow2.f32 %v1305_v22 }
 0x557   :  { %v1429_v5 = vpop.eup %1428 }
 0x558   :  { %v517_v9 = vmul.f32 %v1429_v5, %v515_v31  ;;  %vm522_vm11 = vweird.f32 %v1429_v5  ;;  %v1431_v19 = vpop.eup %1430 }
 0x559   :  { %vm523_vm13 = vmor %vm521_vm12, %vm522_vm11  ;;  %v1433_v23 = vpop.eup %1432 }
 0x55a   :  { %v518_v60 = vsub.f32 1.0, %v517_v9  ;;  %v535_v24 = vadd.f32 1.0, %v1433_v23 }
 0x55c   :  { %v519_v11 = vmul.f32 %v1429_v5, %v518_v60  ;;  %1434 = vrcp.f32 %v535_v24  ;;  %v547_v35 = vand.u32 2147483648, %v535_v24  ;;  %vm541_vm0 = vweird.f32 %v535_v24 }
 0x55d   :  { %v545_v4 = vand.u32 2147483647, %v535_v24 }
 0x55e   :  { %v520_v10 = vadd.f32 %v1429_v5, %v519_v11  ;;  %v548_v37 = vor.u32 1.1754944e-38, %v547_v35 }
 0x55f   :  { %vm546_vm3 = vcmp.eq.f32.partialorder %v545_v4, 8.507059e+37 }
 0x560   :  { %v524_v17 = vsel %vm523_vm13, %v1429_v5, %v520_v10 }
 0x561   :  { %v529_v20 = vsel %vm526_vm14, %v528_v16, %v524_v17 }
 0x562   :  { %v552_v21 = vmul.f32 %v1431_v19, %v529_v20  ;;  %v1435_v25 = vpop.eup %1434  ;;  %v551_v32 = vmul.f32 %v529_v20, %v1816_v47  ;;  %v1849_v47 = vpop.f32.mrf.mxu1 }
 0x563   :  { %v537_v27 = vmul.f32 %v1435_v25, %v535_v24  ;;  %vm542_vm15 = vweird.f32 %v1435_v25 }
 0x564   :  { %554 = vrot.lane.b32.xlu1 %v552_v21, %s1506_s23  ;;  %vm543_vm2 = vmor %vm541_vm0, %vm542_vm15 }
 0x565   :  { %v538_v28 = vsub.f32 1.0, %v537_v27 }
 0x567   :  { %v539_v30 = vmul.f32 %v1435_v25, %v538_v28 }
 0x569   :  { %v540_v34 = vadd.f32 %v1435_v25, %v539_v30 }
 0x56b   :  { %v544_v36 = vsel %vm543_vm2, %v1435_v25, %v540_v34 }
 0x56c   :  { %v549_v40 = vsel %vm546_vm3, %v548_v37, %v544_v36 }
 0x5d6   :  { %v555_v6 = vpop.permute.xlu1 %554 }
 0x5d7   :  { %v557_v33 = vadd.f32 %v555_v6, %v551_v32 }
 0x5d9   :  { %1436 = vtanh.f32 %v557_v33 }
 0x5df   :  { %v1437_v39 = vpop.eup %1436 }
 0x5e0   :  { %v1838_v41 = vmul.f32 %v1437_v39, %v549_v40 }
 0x5e2   :  { %v560_v42 = vpack.c.bf16 %v1838_v41, %v1838_v41 }
 0x5e4   :  { %562 = vrot.lane.b32.xlu2 %v560_v42, %s1506_s23  ;;  %v169_v42 = vadd.f32 %v1845_v45, %v1768_v29 }
 0x63e   :  { %v563_v43 = vpop.permute.xlu2 %562 }
 0x63f   :  { %1306 = vmatmul.msk.bf16.vlgmr.msrb.gmra.mxu0 %vm227_vm1, %v563_v43  ;;  %1307 = vmatmul.msk.bf16.vlgmr.msrb.gmra.mxu1 %vm227_vm1, %v563_v43 }
 0x6bc   :  { %v576_v48 = vpop.f32.mrf.mxu0  ;;  %v589_v50 = vpop.f32.mrf.mxu1 }
 0x6bd   :  { %v593_v51 = vadd.f32 %v576_v48, %v1762_v15  ;;  %v594_v0 = vadd.f32 %v589_v50, %v167_v62 }
 0x6bf   :  { %v1308_v52 = vmul.f32 -1.442695, %v593_v51  ;;  %v1309_v9 = vmul.f32 -1.442695, %v594_v0 }
 0x6c1   :  { %1438 = vpow2.f32 %v1308_v52 }
 0x6c4   :  { %v578_v53 = vpop.f32.mrf.mxu0  ;;  %v591_v56 = vpop.f32.mrf.mxu1 }
 0x6c7   :  { %v1439_v57 = vpop.eup %1438 }
 0x6c8   :  { %v598_v55 = vadd.f32 1.0, %v1439_v57 }
 0x6ca   :  { %1440 = vrcp.f32 %v598_v55  ;;  %v610_v14 = vand.u32 2147483648, %v598_v55  ;;  %v608_v3 = vand.u32 2147483647, %v598_v55  ;;  %vm604_vm5 = vweird.f32 %v598_v55 }
 0x6cb   :  { %1442 = vtanh.f32 %v594_v0 }
 0x6cc   :  { %v611_v15 = vor.u32 1.1754944e-38, %v610_v14  ;;  %vm609_vm7 = vcmp.eq.f32.partialorder %v608_v3, 8.507059e+37  ;;  %1444 = vpow2.f32 %v1309_v9 }
 0x6d0   :  { %v1441_v63 = vpop.eup %1440 }
 0x6d1   :  { %v600_v1 = vmul.f32 %v1441_v63, %v598_v55  ;;  %vm605_vm4 = vweird.f32 %v1441_v63  ;;  %v1443_v49 = vpop.eup %1442 }
 0x6d2   :  { %vm606_vm6 = vmor %vm604_vm5, %vm605_vm4  ;;  %v1445_v60 = vpop.eup %1444 }
 0x6d3   :  { %v601_v59 = vsub.f32 1.0, %v600_v1  ;;  %v618_v61 = vadd.f32 1.0, %v1445_v60 }
 0x6d5   :  { %v602_v26 = vmul.f32 %v1441_v63, %v601_v59  ;;  %1446 = vrcp.f32 %v618_v61  ;;  %v630_v22 = vand.u32 2147483648, %v618_v61  ;;  %vm624_vm9 = vweird.f32 %v618_v61 }
 0x6d6   :  { %v628_v23 = vand.u32 2147483647, %v618_v61 }
 0x6d7   :  { %v603_v31 = vadd.f32 %v1441_v63, %v602_v26  ;;  %v631_v25 = vor.u32 1.1754944e-38, %v630_v22 }
 0x6d8   :  { %vm629_vm11 = vcmp.eq.f32.partialorder %v628_v23, 8.507059e+37 }
 0x6d9   :  { %v607_v38 = vsel %vm606_vm6, %v1441_v63, %v603_v31 }
 0x6da   :  { %v612_v5 = vsel %vm609_vm7, %v611_v15, %v607_v38 }
 0x6db   :  { %v635_v54 = vmul.f32 %v1443_v49, %v612_v5  ;;  %v1447_v11 = vpop.eup %1446  ;;  %v634_v17 = vmul.f32 %v612_v5, %v557_v33 }
 0x6dc   :  { %v620_v13 = vmul.f32 %v1447_v11, %v618_v61  ;;  %vm625_vm8 = vweird.f32 %v1447_v11 }
 0x6dd   :  { %637 = vrot.lane.b32.xlu0 %v635_v54, %s1506_s23  ;;  %vm626_vm10 = vmor %vm624_vm9, %vm625_vm8 }
 0x6de   :  { %v621_v10 = vsub.f32 1.0, %v620_v13 }
 0x6e0   :  { %v622_v16 = vmul.f32 %v1447_v11, %v621_v10 }
 0x6e2   :  { %v623_v21 = vadd.f32 %v1447_v11, %v622_v16 }
 0x6e4   :  { %v627_v24 = vsel %vm626_vm10, %v1447_v11, %v623_v21 }
 0x6e5   :  { %v632_v28 = vsel %vm629_vm11, %v631_v25, %v627_v24 }
 0x74f   :  { %v638_v19 = vpop.permute.xlu0 %637 }
 0x750   :  { %v640_v20 = vadd.f32 %v638_v19, %v634_v17 }
 0x752   :  { %1448 = vtanh.f32 %v640_v20 }
 0x758   :  { %v1449_v27 = vpop.eup %1448 }
 0x759   :  { %v1854_v30 = vmul.f32 %v1449_v27, %v632_v28  ;;  %v172_v27 = vadd.f32 %v1847_v46, %v1768_v29 }
 0x75b   :  { %v643_v32 = vpack.c.bf16 %v1854_v30, %v1854_v30 }
 0x75d   :  { %645 = vrot.lane.b32.xlu1 %v643_v32, %s1506_s23 }
 0x7cf   :  { %v646_v6 = vpop.permute.xlu1 %645 }
 0x7d0   :  { %1310 = vmatmul.msk.bf16.vlgmr.msrb.gmra.mxu2 %vm227_vm1, %v646_v6  ;;  %1311 = vmatmul.msk.bf16.vlgmr.msrb.gmra.mxu3 %vm227_vm1, %v646_v6 }
 0x853   :  { %v659_v33 = vpop.f32.mrf.mxu2  ;;  %v672_v34 = vpop.f32.mrf.mxu3 }
 0x854   :  { %v676_v35 = vadd.f32 %v659_v33, %v1765_v18  ;;  %v677_v44 = vadd.f32 %v672_v34, %v169_v42 }
 0x856   :  { %v1312_v4 = vmul.f32 -1.442695, %v676_v35  ;;  %v1313_v45 = vmul.f32 -1.442695, %v677_v44 }
 0x858   :  { %1450 = vpow2.f32 %v1312_v4 }
 0x85b   :  { %v661_v36 = vpop.f32.mrf.mxu2  ;;  %v674_v37 = vpop.f32.mrf.mxu3 }
 0x85e   :  { %v1451_v39 = vpop.eup %1450 }
 0x85f   :  { %v681_v40 = vadd.f32 1.0, %v1451_v39 }
 0x861   :  { %1452 = vrcp.f32 %v681_v40  ;;  %v693_v51 = vand.u32 2147483648, %v681_v40  ;;  %v691_v53 = vand.u32 2147483647, %v681_v40  ;;  %vm687_vm13 = vweird.f32 %v681_v40 }
 0x862   :  { %1454 = vtanh.f32 %v677_v44 }
 0x863   :  { %v694_v56 = vor.u32 1.1754944e-38, %v693_v51  ;;  %vm692_vm15 = vcmp.eq.f32.partialorder %v691_v53, 8.507059e+37  ;;  %1456 = vpow2.f32 %v1313_v45 }
 0x867   :  { %v1453_v43 = vpop.eup %1452 }
 0x868   :  { %v683_v48 = vmul.f32 %v1453_v43, %v681_v40  ;;  %vm688_vm12 = vweird.f32 %v1453_v43  ;;  %v1455_v55 = vpop.eup %1454 }
 0x869   :  { %vm689_vm14 = vmor %vm687_vm13, %vm688_vm12  ;;  %v1457_v0 = vpop.eup %1456 }
 0x86a   :  { %v684_v50 = vsub.f32 1.0, %v683_v48  ;;  %v701_v1 = vadd.f32 1.0, %v1457_v0 }
 0x86c   :  { %v685_v52 = vmul.f32 %v1453_v43, %v684_v50  ;;  %1458 = vrcp.f32 %v701_v1  ;;  %v713_v5 = vand.u32 2147483648, %v701_v1  ;;  %vm707_vm2 = vweird.f32 %v701_v1 }
 0x86d   :  { %v711_v54 = vand.u32 2147483647, %v701_v1 }
 0x86e   :  { %v686_v18 = vadd.f32 %v1453_v43, %v685_v52  ;;  %v714_v60 = vor.u32 1.1754944e-38, %v713_v5 }
 0x86f   :  { %vm712_vm4 = vcmp.eq.f32.partialorder %v711_v54, 8.507059e+37 }
 0x870   :  { %v690_v57 = vsel %vm689_vm14, %v1453_v43, %v686_v18 }
 0x871   :  { %v695_v62 = vsel %vm692_vm15, %v694_v56, %v690_v57 }
 0x872   :  { %v718_v63 = vmul.f32 %v1455_v55, %v695_v62  ;;  %v1459_v59 = vpop.eup %1458  ;;  %v717_v31 = vmul.f32 %v695_v62, %v640_v20 }
 0x873   :  { %v703_v14 = vmul.f32 %v1459_v59, %v701_v1  ;;  %vm708_vm0 = vweird.f32 %v1459_v59 }
 0x874   :  { %720 = vrot.lane.b32.xlu2 %v718_v63, %s1506_s23  ;;  %vm709_vm3 = vmor %vm707_vm2, %vm708_vm0 }
 0x875   :  { %v704_v26 = vsub.f32 1.0, %v703_v14 }
 0x877   :  { %v705_v3 = vmul.f32 %v1459_v59, %v704_v26 }
 0x879   :  { %v706_v49 = vadd.f32 %v1459_v59, %v705_v3 }
 0x87b   :  { %v710_v9 = vsel %vm709_vm3, %v1459_v59, %v706_v49 }
 0x87c   :  { %v715_v11 = vsel %vm712_vm4, %v714_v60, %v710_v9  ;;  %v174_v9 = vadd.f32 %v1849_v47, %v1768_v29 }
 0x8ce   :  { %v721_v15 = vpop.permute.xlu2 %720 }
 0x8cf   :  { %v723_v38 = vadd.f32 %v721_v15, %v717_v31 }
 0x8d1   :  { %1460 = vtanh.f32 %v723_v38 }
 0x8d7   :  { %v1461_v61 = vpop.eup %1460 }
 0x8d8   :  { %v1865_v13 = vmul.f32 %v1461_v61, %v715_v11 }
 0x8da   :  { %v726_v10 = vpack.c.bf16 %v1865_v13, %v1865_v13 }
 0x8dc   :  { %728 = vrot.lane.b32.xlu0 %v726_v10, %s1506_s23 }
 0x94e   :  { %v729_v16 = vpop.permute.xlu0 %728 }
 0x94f   :  { %1314 = vmatmul.msk.bf16.vlgmr.msra.gmra.mxu0 %vm227_vm1, %v729_v16  ;;  %1315 = vmatmul.msk.bf16.vlgmr.msra.gmra.mxu1 %vm227_vm1, %v729_v16 }
 0x9cc   :  { %v742_v17 = vpop.f32.mrf.mxu0  ;;  %v755_v19 = vpop.f32.mrf.mxu1 }
 0x9cd   :  { %v759_v20 = vadd.f32 %v742_v17, %v1753_v8  ;;  %v760_v32 = vadd.f32 %v755_v19, %v172_v27 }
 0x9cf   :  { %v1316_v21 = vmul.f32 -1.442695, %v759_v20  ;;  %v1317_v46 = vmul.f32 -1.442695, %v760_v32 }
 0x9d1   :  { %1462 = vpow2.f32 %v1316_v21 }
 0x9d4   :  { %v744_v22 = vpop.f32.mrf.mxu0  ;;  %v757_v23 = vpop.f32.mrf.mxu1 }
 0x9d7   :  { %v1463_v24 = vpop.eup %1462 }
 0x9d8   :  { %v764_v25 = vadd.f32 1.0, %v1463_v24 }
 0x9da   :  { %1464 = vrcp.f32 %v764_v25  ;;  %v776_v34 = vand.u32 2147483648, %v764_v25  ;;  %v774_v4 = vand.u32 2147483647, %v764_v25  ;;  %vm770_vm6 = vweird.f32 %v764_v25 }
 0x9db   :  { %1466 = vtanh.f32 %v760_v32  ;;  %v1374_v32 = vld [vmem:[%s2018_s6 + $0x18] sm:$0xff] }
 0x9dc   :  { %v777_v36 = vor.u32 1.1754944e-38, %v776_v34  ;;  %vm775_vm8 = vcmp.eq.f32.partialorder %v774_v4, 8.507059e+37  ;;  %1468 = vpow2.f32 %v1317_v46  ;;  %991 = vmatpush.bf16.msrb.mxu0 %v1374_v32  ;;  %v1372_v4 = vld [vmem:[%s2018_s6 + $0x8] sm:$0xff] }
 0x9e0   :  { %v1465_v28 = vpop.eup %1464 }
 0x9e1   :  { %v766_v6 = vmul.f32 %v1465_v28, %v764_v25  ;;  %vm771_vm5 = vweird.f32 %v1465_v28  ;;  %v1467_v39 = vpop.eup %1466 }
 0x9e2   :  { %vm772_vm7 = vmor %vm770_vm6, %vm771_vm5  ;;  %v1469_v43 = vpop.eup %1468 }
 0x9e3   :  { %v767_v33 = vsub.f32 1.0, %v766_v6  ;;  %v784_v44 = vadd.f32 1.0, %v1469_v43 }
 0x9e5   :  { %v768_v35 = vmul.f32 %v1465_v28, %v767_v33  ;;  %1470 = vrcp.f32 %v784_v44  ;;  %v796_v55 = vand.u32 2147483648, %v784_v44  ;;  %vm790_vm10 = vweird.f32 %v784_v44 }
 0x9e7   :  { %v769_v8 = vadd.f32 %v1465_v28, %v768_v35  ;;  %v797_v63 = vor.u32 1.1754944e-38, %v796_v55 }
 0x9e9   :  { %v773_v37 = vsel %vm772_vm7, %v1465_v28, %v769_v8  ;;  %vm1069_vm7 = vcmask 1041409  }
 0x9ea   :  { %v778_v40 = vsel %vm775_vm8, %v777_v36, %v773_v37  ;;  %vm1071_vm8 = vcmask 1042434  }
 0x9eb   :  { %v801_v42 = vmul.f32 %v1467_v39, %v778_v40  ;;  %v1471_v48 = vpop.eup %1470  ;;  %v800_v53 = vmul.f32 %v778_v40, %v723_v38  ;;  %v1371_v39 = vld [vmem:[%s2018_s6] sm:$0xff] }
 0x9ec   :  { %v786_v50 = vmul.f32 %v1471_v48, %v784_v44  ;;  %vm791_vm9 = vweird.f32 %v1471_v48 }
 0x9ed   :  { %803 = vrot.lane.b32.xlu1 %v801_v42, %s1506_s23  ;;  %vm792_vm11 = vmor %vm790_vm10, %vm791_vm9  ;;  %vm1073_vm9 = vcmask 1043459   ;;  %vm1075_vm10 = vcmask 1044484  }
 0x9ee   :  { %v787_v51 = vsub.f32 1.0, %v786_v50 }
 0x9f0   :  { %v788_v52 = vmul.f32 %v1471_v48, %v787_v51 }
 0x9f2   :  { %v789_v57 = vadd.f32 %v1471_v48, %v788_v52 }
 0x9f4   :  { %v793_v62 = vsel %vm792_vm11, %v1471_v48, %v789_v57  ;;  %vm1077_vm11 = vcmask 1045509  }
 0x9f5   :  { %896 = vrot.lane.b32.xlu1 %v1775_v7, %s1506_s23  ;;  %v794_v7 = vand.u32 2147483647, %v784_v44  ;;  %v892_v44 = vlaneseq }
 0x9f7   :  { %vm795_vm12 = vcmp.eq.f32.partialorder %v794_v7, 8.507059e+37  ;;  %v1914_v50 = vand.u32 127, %v892_v44 }
 0x9f8   :  { %v798_v0 = vsel %vm795_vm12, %v797_v63, %v793_v62  ;;  %vm1079_vm12 = vcmask 1046534  }
 0x9f9   :  { %vm894_vm6 = vcmp.lt.s32.totalorder %v1914_v50, 32 }
 0xa5f   :  { %v804_v18 = vpop.permute.xlu1 %803 }
 0xa60   :  { %v1878_v56 = vadd.f32 %v804_v18, %v800_v53 }
 0xa62   :  { %1472 = vtanh.f32 %v1878_v56 }
 0xa67   :  { %v897_v48 = vpop.permute.xlu1 %896 }
 0xa68   :  { %v1473_v45 = vpop.eup %1472 }
 0xa69   :  { %v808_v1 = vmul.f32 %v1473_v45, %v798_v0 }
 0xa6b   :  { %909 = vrot.lane.b32.xlu1 %v808_v1, %s1506_s23  ;;  %v809_v59 = vpack.c.bf16 %v808_v1, %v808_v1 }
 0xa6d   :  { %811 = vrot.lane.b32.xlu2 %v809_v59, %s1506_s23 }
 0xa73   :  { %923 = vrot.lane.b32.xlu1 %v1838_v41, %s1506_s23 }
 0xac7   :  { %v812_v14 = vpop.permute.xlu2 %811 }
 0xac8   :  { %1318 = vmatmul.msk.bf16.vlgmr.msra.gmra.mxu2 %vm227_vm1, %v812_v14  ;;  %1319 = vmatmul.msk.bf16.vlgmr.msra.gmra.mxu3 %vm227_vm1, %v812_v14 }
 0xadd   :  { %v910_v52 = vpop.permute.xlu1 %909 }
 0xae5   :  { %v924_v57 = vpop.permute.xlu1 %923 }
 0xb4b   :  { %v825_v26 = vpop.f32.mrf.mxu2  ;;  %v838_v3 = vpop.f32.mrf.mxu3 }
 0xb4c   :  { %v842_v31 = vadd.f32 %v825_v26, %v1759_v12  ;;  %v843_v60 = vadd.f32 %v838_v3, %v174_v9 }
 0xb4e   :  { %v1320_v15 = vmul.f32 -1.442695, %v842_v31  ;;  %v1321_v29 = vmul.f32 -1.442695, %v843_v60  ;;  %v1387_v31 = vld [vmem:[%s2019_s7] ss:$0 sm:$0xff] }
 0xb50   :  { %1474 = vpow2.f32 %v1320_v15 }
 0xb53   :  { %v827_v38 = vpop.f32.mrf.mxu2  ;;  %v840_v49 = vpop.f32.mrf.mxu3 }
 0xb54   :  { %v1388_v49 = vld [vmem:[%s2020_s8] ss:$0 sm:$0xff] }
 0xb56   :  { %v1475_v5 = vpop.eup %1474 }
 0xb57   :  { %v847_v54 = vadd.f32 1.0, %v1475_v5 }
 0xb59   :  { %1476 = vrcp.f32 %v847_v54  ;;  %v859_v10 = vand.u32 2147483648, %v847_v54  ;;  %v857_v17 = vand.u32 2147483647, %v847_v54  ;;  %vm853_vm14 = vweird.f32 %v847_v54 }
 0xb5a   :  { %1478 = vtanh.f32 %v843_v60 }
 0xb5b   :  { %v860_v19 = vor.u32 1.1754944e-38, %v859_v10  ;;  %vm858_vm0 = vcmp.eq.f32.partialorder %v857_v17, 8.507059e+37  ;;  %1480 = vpow2.f32 %v1321_v29 }
 0xb5f   :  { %v1477_v41 = vpop.eup %1476 }
 0xb60   :  { %v849_v61 = vmul.f32 %v1477_v41, %v847_v54  ;;  %vm854_vm13 = vweird.f32 %v1477_v41  ;;  %v1479_v21 = vpop.eup %1478 }
 0xb61   :  { %vm855_vm15 = vmor %vm853_vm14, %vm854_vm13  ;;  %v1481_v47 = vpop.eup %1480  ;;  %vm1081_vm13 = vcmask 1047559   ;;  %vm1052_vm14 = vcmp.lt.s32.totalorder %v1914_v50, 2 }
 0xb62   :  { %v850_v11 = vsub.f32 1.0, %v849_v61  ;;  %v867_v24 = vadd.f32 1.0, %v1481_v47 }
 0xb64   :  { %v851_v16 = vmul.f32 %v1477_v41, %v850_v11  ;;  %1482 = vrcp.f32 %v867_v24  ;;  %v879_v8 = vand.u32 2147483648, %v867_v24  ;;  %vm873_vm3 = vweird.f32 %v867_v24 }
 0xb65   :  { %v877_v36 = vand.u32 2147483647, %v867_v24 }
 0xb66   :  { %v852_v12 = vadd.f32 %v1477_v41, %v851_v16  ;;  %v880_v40 = vor.u32 1.1754944e-38, %v879_v8 }
 0xb67   :  { %vm878_vm5 = vcmp.eq.f32.partialorder %v877_v36, 8.507059e+37 }
 0xb68   :  { %v856_v20 = vsel %vm855_vm15, %v1477_v41, %v852_v12  ;;  %vm1085_vm15 = vcmask 64512  }
 0xb69   :  { %v861_v22 = vsel %vm858_vm0, %v860_v19, %v856_v20 }
 0xb6a   :  { %v884_v23 = vmul.f32 %v1479_v21, %v861_v22  ;;  %v1483_v25 = vpop.eup %1482 }
 0xb6b   :  { %v869_v27 = vmul.f32 %v1483_v25, %v867_v24  ;;  %vm874_vm2 = vweird.f32 %v1483_v25 }
 0xb6c   :  { %886 = vrot.lane.b32.xlu0 %v884_v23, %s1506_s23  ;;  %vm875_vm4 = vmor %vm873_vm3, %vm874_vm2 }
 0xb6d   :  { %v870_v28 = vsub.f32 1.0, %v869_v27 }
 0xb6f   :  { %v871_v6 = vmul.f32 %v1483_v25, %v870_v28 }
 0xb71   :  { %v872_v35 = vadd.f32 %v1483_v25, %v871_v6 }
 0xb73   :  { %v876_v37 = vsel %vm875_vm4, %v1483_v25, %v872_v35 }
 0xb74   :  { %905 = vrot.lane.b32.xlu0 %v1797_v2, %s1506_s23  ;;  %v1373_v2 = vld [vmem:[%s2018_s6 + $0x10] sm:$0xff]  ;;  %v881_v46 = vsel %vm878_vm5, %v880_v40, %v876_v37 }
 0xb75   :  { %992 = vmatpush.bf16.msrb.mxu0 %v1373_v2 }
 0xb79   :  { %993 = vmatpush.bf16.msrb.mxu0 %v1372_v4 }
 0xb7c   :  { %918 = vrot.lane.b32.xlu0 %v1865_v13, %s1506_s23  ;;  %v883_v13 = vmul.f32 %v861_v22, %v1878_v56 }
 0xb7d   :  { %994 = vmatpush.bf16.msrb.mxu0 %v1371_v39 }
 0xbde   :  { %v887_v33 = vpop.permute.xlu0 %886 }
 0xbdf   :  { %v889_v34 = vadd.f32 %v887_v33, %v883_v13 }
 0xbe1   :  { %1484 = vtanh.f32 %v889_v34 }
 0xbe6   :  { %v906_v51 = vpop.permute.xlu0 %905 }
 0xbe7   :  { %v1485_v42 = vpop.eup %1484  ;;  %v1919_v18 = vsel %vm894_vm6, %v906_v51, %v910_v52  ;;  %v1956_v26 = vsel %vm894_vm6, %v910_v52, %v906_v51 }
 0xbe8   :  { %v891_v43 = vmul.f32 %v1485_v42, %v881_v46 }
 0xbea   :  { %900 = vrot.lane.b32.xlu2 %v891_v43, %s1506_s23 }
 0xbee   :  { %v919_v55 = vpop.permute.xlu0 %918 }
 0xbf2   :  { %914 = vrot.lane.b32.xlu2 %v1819_v58, %s1506_s23 }
 0xbfa   :  { %927 = vrot.lane.b32.xlu2 %v1854_v30, %s1506_s23 }
 0xc44   :  { %v901_v53 = vpop.permute.xlu2 %900 }
 0xc45   :  { %v1923_v58 = vsel %vm894_vm6, %v897_v48, %v901_v53  ;;  %v1952_v14 = vsel %vm894_vm6, %v901_v53, %v897_v48 }
 0xc46   :  { %v935_v30 = vpack.c.bf16 %v1919_v18, %v1923_v58  ;;  %v938_v3 = vpack.c.bf16 %v1952_v14, %v1956_v26 }
 0xc48   :  { %1338 = vmatmul.msk.bf16.vlgmr.msrb.gmra.mxu0 %vm227_vm1, %v935_v30 }
 0xc4c   :  { %v915_v56 = vpop.permute.xlu2 %914 }
 0xc4d   :  { %v1930_v62 = vsel %vm894_vm6, %v915_v56, %v919_v55  ;;  %v1945_v1 = vsel %vm894_vm6, %v919_v55, %v915_v56 }
 0xc54   :  { %v928_v7 = vpop.permute.xlu2 %927 }
 0xc55   :  { %v1934_v63 = vsel %vm894_vm6, %v924_v57, %v928_v7  ;;  %v1941_v0 = vsel %vm894_vm6, %v928_v7, %v924_v57 }
 0xc56   :  { %v936_v45 = vpack.c.bf16 %v1934_v63, %v1930_v62  ;;  %v937_v59 = vpack.c.bf16 %v1945_v1, %v1941_v0 }
 0xc58   :  { %1339 = vmatmul.msk.bf16.gmra.mxu0 %vm227_vm1, %v936_v45 }
 0xc68   :  { %1340 = vmatmul.msk.bf16.gmra.mxu0 %vm227_vm1, %v937_v59 }
 0xc78   :  { %1341 = vmatmul.msk.bf16.gmra.mxu0 %vm227_vm1, %v938_v3 }
 0xcc5   :  { %v996_v15 = vpop.f32.mrf.mxu0 }
 0xcc6   :  { %v997_v38 = vadd.f32 %v1387_v31, %v996_v15 }
 0xcc8   :  { %1486 = vtanh.f32 %v997_v38 }
 0xccd   :  { %v998_v5 = vpop.f32.mrf.mxu0 }
 0xcce   :  { %v1487_v54 = vpop.eup %1486  ;;  %v999_v9 = vadd.f32 %v1387_v31, %v998_v5 }
 0xccf   :  { %v1028_v41 = vmul.f32 %v1487_v54, %v1388_v49 }
 0xcd0   :  { %1488 = vtanh.f32 %v999_v9 }
 0xcd1   :  { %1036 = vadd.xlane.f32.xlu0 %v1028_v41 }
 0xcd5   :  { %v1001_v60 = vpop.f32.mrf.mxu0 }
 0xcd6   :  { %v1489_v61 = vpop.eup %1488  ;;  %v1002_v11 = vadd.f32 %v1387_v31, %v1001_v60 }
 0xcd7   :  { %v1029_v10 = vmul.f32 %v1489_v61, %v1388_v49 }
 0xcd8   :  { %1490 = vtanh.f32 %v1002_v11  ;;  %v1099_v11 = vshrl.u32 %v892_v44, 7 }
 0xcd9   :  { %1038 = vadd.xlane.f32.xlu1 %v1029_v10 }
 0xcda   :  { %1386 = vset.pattern.permute.xlu2 %v1099_v11  ;;  %1385 = vset.pattern.permute.xlu1 %v1099_v11 }
 0xcdb   :  { %1384 = vset.pattern.permute.xlu0 %v1099_v11 }
 0xcdd   :  { %v1003_v16 = vpop.f32.mrf.mxu0 }
 0xcde   :  { %v1491_v17 = vpop.eup %1490  ;;  %v1004_v12 = vadd.f32 %v1387_v31, %v1003_v16 }
 0xcdf   :  { %v1030_v19 = vmul.f32 %v1491_v17, %v1388_v49 }
 0xce0   :  { %1492 = vtanh.f32 %v1004_v12 }
 0xce1   :  { %1040 = vadd.xlane.f32.xlu2 %v1030_v19 }
 0xce5   :  { %v1006_v20 = vpop.f32.mrf.mxu0 }
 0xce6   :  { %v1493_v21 = vpop.eup %1492  ;;  %v1007_v22 = vadd.f32 %v1387_v31, %v1006_v20 }
 0xce7   :  { %v1031_v23 = vmul.f32 %v1493_v21, %v1388_v49 }
 0xce8   :  { %1494 = vtanh.f32 %v1007_v22 }
 0xce9   :  { %1042 = vadd.xlane.f32.xlu2 %v1031_v23 }
 0xced   :  { %v1008_v29 = vpop.f32.mrf.mxu0 }
 0xcee   :  { %v1495_v47 = vpop.eup %1494  ;;  %v1009_v24 = vadd.f32 %v1387_v31, %v1008_v29  ;;  %v1378_v29 = vld [vmem:[%s2022_s9 + $0x18] sm:$0xff] }
 0xcef   :  { %v1032_v25 = vmul.f32 %v1495_v47, %v1388_v49  ;;  %1220 = vmatpush.bf16.msrb.mxu1 %v1378_v29  ;;  %v1377_v47 = vld [vmem:[%s2022_s9 + $0x10] sm:$0xff] }
 0xcf0   :  { %1496 = vtanh.f32 %v1009_v24  ;;  %v1376_v24 = vld [vmem:[%s2022_s9 + $0x8] sm:$0xff] }
 0xcf1   :  { %1044 = vadd.xlane.f32.xlu0 %v1032_v25  ;;  %v1375_v25 = vld [vmem:[%s2022_s9] sm:$0xff] }
 0xcf3   :  { %1221 = vmatpush.bf16.msrb.mxu1 %v1377_v47 }
 0xcf5   :  { %v1011_v27 = vpop.f32.mrf.mxu0 }
 0xcf6   :  { %v1497_v28 = vpop.eup %1496  ;;  %v1012_v32 = vadd.f32 %v1387_v31, %v1011_v27 }
 0xcf7   :  { %v1033_v6 = vmul.f32 %v1497_v28, %v1388_v49  ;;  %1222 = vmatpush.bf16.msrb.mxu1 %v1376_v24 }
 0xcf8   :  { %1498 = vtanh.f32 %v1012_v32 }
 0xcf9   :  { %1046 = vadd.xlane.f32.xlu1 %v1033_v6 }
 0xcfb   :  { %1223 = vmatpush.bf16.msrb.mxu1 %v1375_v25 }
 0xcfd   :  { %v1013_v2 = vpop.f32.mrf.mxu0 }
 0xcfe   :  { %v1499_v13 = vpop.eup %1498  ;;  %v1014_v33 = vadd.f32 %v1387_v31, %v1013_v2 }
 0xcff   :  { %v1034_v34 = vmul.f32 %v1499_v13, %v1388_v49 }
 0xd00   :  { %1500 = vtanh.f32 %v1014_v33 }
 0xd01   :  { %1048 = vadd.xlane.f32.xlu2 %v1034_v34 }
 0xd06   :  { %v1501_v35 = vpop.eup %1500 }
 0xd07   :  { %v1035_v4 = vmul.f32 %v1501_v35, %v1388_v49 }
 0xd09   :  { %1050 = vadd.xlane.f32.xlu0 %v1035_v4 }
 0xd44   :  { %v1037_v36 = vpop.xlane.xlu0 %1036 }
 0xd45   :  { %v1061_v48 = vperm.slane %v1037_v36, %v1914_v50 }
 0xd4c   :  { %v1039_v37 = vpop.xlane.xlu1 %1038 }
 0xd4d   :  { %v1062_v42 = vperm.slane %v1039_v37, %v1914_v50 }
 0xd4f   :  { %v1070_v30 = vsel %vm1069_vm7, %v1062_v42, %v1061_v48 }
 0xd54   :  { %v1041_v8 = vpop.xlane.xlu2 %1040 }
 0xd55   :  { %v1063_v46 = vperm.slane %v1041_v8, %v1914_v50 }
 0xd57   :  { %v1072_v57 = vsel %vm1071_vm8, %v1063_v46, %v1070_v30 }
 0xd5c   :  { %v1043_v39 = vpop.xlane.xlu2 %1042 }
 0xd5d   :  { %v1064_v51 = vperm.slane %v1043_v39, %v1914_v50 }
 0xd5f   :  { %v1074_v7 = vsel %vm1073_vm9, %v1064_v51, %v1072_v57 }
 0xd64   :  { %v1045_v40 = vpop.xlane.xlu0 %1044 }
 0xd65   :  { %v1065_v53 = vperm.slane %v1045_v40, %v1914_v50 }
 0xd67   :  { %v1076_v45 = vsel %vm1075_vm10, %v1065_v53, %v1074_v7 }
 0xd6c   :  { %v1047_v43 = vpop.xlane.xlu1 %1046 }
 0xd6d   :  { %v1066_v56 = vperm.slane %v1047_v43, %v1914_v50 }
 0xd6f   :  { %v1078_v3 = vsel %vm1077_vm11, %v1066_v56, %v1076_v45 }
 0xd74   :  { %v1049_v52 = vpop.xlane.xlu2 %1048 }
 0xd75   :  { %v1067_v55 = vperm.slane %v1049_v52, %v1914_v50 }
 0xd77   :  { %v1080_v15 = vsel %vm1079_vm12, %v1067_v55, %v1078_v3 }
 0xd7c   :  { %v1051_v59 = vpop.xlane.xlu0 %1050 }
 0xd7d   :  { %v1068_v31 = vperm.slane %v1051_v59, %v1914_v50 }
 0xd7f   :  { %v1082_v38 = vsel %vm1081_vm13, %v1068_v31, %v1080_v15 }
 0xd80   :  { %v1084_v49 = vsel %vm1052_vm14, %v1082_v38, -1e+30 }
 0xd81   :  { %v1086_v5 = vsel %vm1085_vm15, %v1084_v49, -inf }
 0xd82   :  { %1087 = vmax.xlane.f32.xlu1 %v1086_v5 }
 0xdf5   :  { %v1088_v54 = vpop.xlane.xlu1 %1087 }
 0xdf6   :  { %v1089_v9 = vsub.f32 %v1084_v49, %v1088_v54 }
 0xdf8   :  { %v1090_v41 = vmul.f32 1.442695, %v1089_v9 }
 0xdfa   :  { %1502 = vpow2.f32 %v1090_v41 }
 0xe00   :  { %v1503_v60 = vpop.eup %1502 }
 0xe01   :  { %v1092_v61 = vsel %vm1085_vm15, %v1503_v60, 0.0 }
 0xe02   :  { %1093 = vadd.xlane.f32.xlu2 %v1092_v61 }
 0xe75   :  { %v1094_v10 = vpop.xlane.xlu2 %1093 }
 0xe76   :  { %1504 = vrcp.f32 %v1094_v10 }
 0xe7c   :  { %v1505_v50 = vpop.eup %1504 }
 0xe7d   :  { %v1096_v16 = vmul.f32 %v1505_v50, %v1503_v60 }
 0xe7f   :  { %v1111_v17 = vperm.slane %v1096_v16, 2  ;;  %v1104_v12 = vperm.slane %v1096_v16, 1  ;;  %v1097_v19 = vperm.slane %v1096_v16, 0  ;;  %v1125_v20 = vperm.slane %v1096_v16, 4 }
 0xe80   :  { %v1118_v21 = vperm.slane %v1096_v16, 3  ;;  %v1146_v22 = vperm.slane %v1096_v16, 7  ;;  %v1139_v44 = vperm.slane %v1096_v16, 6  ;;  %v1132_v23 = vperm.slane %v1096_v16, 5 }
 0xe81   :  { %1116 = vperm.xlu2 %1386, %v1111_v17   ;;  %1109 = vperm.xlu1 %1385, %v1104_v12  }
 0xe82   :  { %1102 = vperm.xlu0 %1384, %v1097_v19  }
 0xe89   :  { %1130 = vperm.xlu2 %1386, %v1125_v20   ;;  %1123 = vperm.xlu1 %1385, %v1118_v21  }
 0xe8a   :  { %1151 = vperm.xlu0 %1384, %v1146_v22  }
 0xe91   :  { %1144 = vperm.xlu2 %1386, %v1139_v44   ;;  %1137 = vperm.xlu1 %1385, %v1132_v23  }
 0xedb   :  { %v1117_v27 = vpop.permute.xlu2 %1116 }
 0xedc   :  { %v1155_v35 = vmul.f32 %v1117_v27, %v1930_v62 }
 0xede   :  { %v1164_v37 = vsel %vm227_vm1, %v1155_v35, 0.0 }
 0xee3   :  { %v1131_v13 = vpop.permute.xlu2 %1130 }
 0xeeb   :  { %v1145_v42 = vpop.permute.xlu2 %1144 }
 0xeec   :  { %v1159_v51 = vmul.f32 %v1145_v42, %v1956_v26  ;;  %v1389_v26 = vld [vmem:[%s2021_s10] ss:$0 sm:$0xff] }
 0xeee   :  { %v1172_v56 = vsel %vm227_vm1, %v1159_v51, 0.0 }
 0xef3   :  { %v1110_v28 = vpop.permute.xlu1 %1109 }
 0xef4   :  { %v1154_v32 = vmul.f32 %v1110_v28, %v1919_v18  ;;  %v1103_v6 = vpop.permute.xlu0 %1102  ;;  %v1157_v18 = vmul.f32 %v1131_v13, %v1941_v0 }
 0xef5   :  { %v1153_v2 = vmul.f32 %v1103_v6, %v1923_v58 }
 0xef6   :  { %v1162_v33 = vsel %vm227_vm1, %v1154_v32, 0.0  ;;  %v1168_v48 = vsel %vm227_vm1, %v1157_v18, 0.0 }
 0xef7   :  { %v1161_v34 = vsel %vm227_vm1, %v1153_v2, 0.0 }
 0xef8   :  { %v1163_v4 = vadd.f32 %v1162_v33, %v1161_v34 }
 0xefa   :  { %v1165_v40 = vadd.f32 %v1164_v37, %v1163_v4 }
 0xefb   :  { %v1124_v8 = vpop.permute.xlu1 %1123 }
 0xefc   :  { %v1156_v36 = vmul.f32 %v1124_v8, %v1934_v63  ;;  %v1152_v46 = vpop.permute.xlu0 %1151 }
 0xefd   :  { %v1160_v63 = vmul.f32 %v1152_v46, %v1952_v14 }
 0xefe   :  { %v1166_v39 = vsel %vm227_vm1, %v1156_v36, 0.0 }
 0xeff   :  { %v1167_v58 = vadd.f32 %v1166_v39, %v1165_v40  ;;  %v1174_v0 = vsel %vm227_vm1, %v1160_v63, 0.0 }
 0xf01   :  { %v1169_v52 = vadd.f32 %v1168_v48, %v1167_v58 }
 0xf03   :  { %v1138_v43 = vpop.permute.xlu1 %1137 }
 0xf04   :  { %v1158_v62 = vmul.f32 %v1138_v43, %v1945_v1 }
 0xf06   :  { %v1170_v53 = vsel %vm227_vm1, %v1158_v62, 0.0 }
 0xf07   :  { %v1171_v30 = vadd.f32 %v1170_v53, %v1169_v52 }
 0xf09   :  { %v1173_v57 = vadd.f32 %v1172_v56, %v1171_v30 }
 0xf0b   :  { %v1175_v55 = vadd.f32 %v1174_v0, %v1173_v57 }
 0xf0d   :  { %v1176_v7 = vpack.c.bf16 %v1175_v55, %v1175_v55 }
 0xf0f   :  { %1358 = vmatmul.msk.bf16.vlgmr.msrb.gmra.mxu1 %vm227_vm1, %v1176_v7 }
 0xf8c   :  { %v1225_v1 = vpop.f32.mrf.mxu1 }
 0xf8d   :  { %v1226_v45 = vadd.f32 %v1389_v26, %v1225_v1 }
 0xf8f   :  { %1229 = vst [vmem:[%s2023_s11] sm:$0xff] %v1226_v45 }
 0xf94   :  { %v1227_v14 = vpop.f32.mrf.mxu1 }

</bundles_post_ra>
